<compile_context>
chip_gen: v5e
topology: v5e:2x2
jax: 0.10.0
libtpu: 0.0.40
codegen_flags: <defaults>
</compile_context>

<pallas_src>
import functools

import jax
import jax.numpy as jnp
from jax import lax
from jax.experimental import pallas as pl
from jax.experimental.pallas import tpu as pltpu


# ----------------------------------------------------------------------------
# Fused kernel
# ----------------------------------------------------------------------------
def _vgae_fused_kernel(x_ref, adj_ref, w1_ref, w23_ref,
                       hidden1_ref, mu_ref, logvar_ref, adjrec_ref,
                       z_scr, *, h2: int, tm: int):
    """Whole VGAE forward; grid iterates over row tiles of adj_rec.

    Encoder (both GCN layers) runs once on step 0; its outputs live in
    resident VMEM output blocks and z is cached (bf16) in a VMEM scratch that
    persists across grid steps.  Every step emits one (tm, N) tile of the
    inner-product decoder.
    """
    step = pl.program_id(0)

    # ---------------- Encoder: run once, results persist across the grid ----
    @pl.when(step == 0)
    def _encode():
        adj_bf = adj_ref[...].astype(jnp.bfloat16)

        # gc1: hidden1 = relu(adj @ (x @ W1))  -- bf16 operands, f32 accumulate
        support1 = jnp.dot(
            x_ref[...].astype(jnp.bfloat16),
            w1_ref[...].astype(jnp.bfloat16),
            preferred_element_type=jnp.float32)
        hidden1 = jnp.maximum(
            jnp.dot(adj_bf, support1.astype(jnp.bfloat16),
                    preferred_element_type=jnp.float32),
            0.0)
        hidden1_ref[...] = hidden1  # direct store; frees vregs before layer 2

        # gc2|gc3 fused: [mu | logvar] = adj @ (hidden1 @ [W2 | W3])
        support23 = jnp.dot(
            hidden1.astype(jnp.bfloat16),
            w23_ref[...].astype(jnp.bfloat16),
            preferred_element_type=jnp.float32)
        mu_logvar = jnp.dot(adj_bf, support23.astype(jnp.bfloat16),
                            preferred_element_type=jnp.float32)
        mu = mu_logvar[:, :h2]
        mu_ref[...] = mu
        logvar_ref[...] = mu_logvar[:, h2:]

        # Eval-mode reparameterize: z = mu.
        # TODO(synk): training-mode reparameterization (mu + eps*exp(logvar))
        # and dropout RNG not implemented (eval semantics only).
        z_scr[...] = mu.astype(jnp.bfloat16)

    # ---------------- Decoder row tile: adj_rec[rows] = z[rows] @ z.T -------
    row0 = pl.multiple_of(step * tm, tm)
    z_rows = z_scr[pl.ds(row0, tm), :]
    # Contract the last dims of both operands: no explicit transpose of z.
    adjrec_ref[...] = lax.dot_general(
        z_rows, z_scr[...],
        dimension_numbers=(((1,), (1,)), ((), ())),
        preferred_element_type=jnp.float32)


# ----------------------------------------------------------------------------
# Wrapper
# ----------------------------------------------------------------------------
def vgae_forward(x, adj, w1, w2, w3, *, tm=128):
    """VGAE.forward in eval mode (dropout off, z = mu, decoder act = identity)."""
    n, f_in = x.shape
    h1 = w1.shape[1]
    h2 = w2.shape[1]
    tm = min(tm, n)
    assert n % tm == 0, "N must be divisible by the decoder row tile"

    # Merge gc2 / gc3 weights into one wide matmul operand (wrapper-side).
    w23 = jnp.concatenate([w2, w3], axis=1)  # [H1, 2*H2]

    def full(shape):
        # Whole-array resident block (allowed for non-(8,128) dims since
        # block_shape == array shape); constant index_map -> fetched once.
        return pl.BlockSpec(shape, lambda i, _s=len(shape): (0,) * _s)

    # Advisory cost for XLA's scheduler around the fused call.
    flops = 2 * n * (f_in * h1 + n * h1 + h1 * 2 * h2 + n * 2 * h2 + n * h2)
    bytes_accessed = 4 * (n * f_in + n * n + f_in * h1 + h1 * 2 * h2
                          + n * h1 + 2 * n * h2 + n * n)

    hidden1, mu, logvar, adj_rec = pl.pallas_call(
        functools.partial(_vgae_fused_kernel, h2=h2, tm=tm),
        out_shape=(
            jax.ShapeDtypeStruct((n, h1), jnp.float32),   # hidden1
            jax.ShapeDtypeStruct((n, h2), jnp.float32),   # mu
            jax.ShapeDtypeStruct((n, h2), jnp.float32),   # logvar
            jax.ShapeDtypeStruct((n, n), jnp.float32),    # adj_rec
        ),
        grid_spec=pltpu.PrefetchScalarGridSpec(
            num_scalar_prefetch=0,
            grid=(n // tm,),
            in_specs=[
                full(x.shape),
                full(adj.shape),
                full(w1.shape),
                full(w23.shape),
            ],
            out_specs=(
                full((n, h1)),
                full((n, h2)),
                full((n, h2)),
                pl.BlockSpec((tm, n), lambda i: (i, 0)),  # tiled decoder output
            ),
            scratch_shapes=[pltpu.VMEM((n, h2), jnp.bfloat16)],  # z cache
        ),
        compiler_params=pltpu.CompilerParams(
            # Steps > 0 read the z scratch written at step 0 -> must be serial.
            dimension_semantics=("arbitrary",),
        ),
        cost_estimate=pl.CostEstimate(
            flops=flops, transcendentals=0, bytes_accessed=bytes_accessed),
    )(x, adj, w1, w23)

    z = mu  # eval-mode reparameterize
    return hidden1, adj_rec, mu, logvar, z


# ----------------------------------------------------------------------------
# Main
# ----------------------------------------------------------------------------
if __name__ == "__main__":
    # Small, TPU-friendly shapes (2 decoder row tiles at tm=128).
    N = 256           # number of graph nodes
    F_IN = 64         # input_feat_dim
    H1 = 64           # hidden_dim1
    H2 = 32           # hidden_dim2

    key = jax.random.PRNGKey(0)
    kx, kadj, k1, k2, k3 = jax.random.split(key, 5)

    x = jax.random.normal(kx, (N, F_IN), dtype=jnp.float32)

    # Symmetric, row-normalized dense adjacency (as a GCN would consume).
    a = (jax.random.uniform(kadj, (N, N)) < 0.05).astype(jnp.float32)
    a = jnp.maximum(a, a.T) + jnp.eye(N, dtype=jnp.float32)
    adj = a / jnp.sum(a, axis=1, keepdims=True)

    # Deterministic glorot-style weight init (matches GraphConvolution shapes).
    def glorot(k, fan_in, fan_out):
        scale = jnp.sqrt(6.0 / (fan_in + fan_out))
        return jax.random.uniform(
            k, (fan_in, fan_out), minval=-scale, maxval=scale, dtype=jnp.float32
        )

    w1 = glorot(k1, F_IN, H1)
    w2 = glorot(k2, H1, H2)
    w3 = glorot(k3, H1, H2)

    hidden1, adj_rec, mu, logvar, z = jax.block_until_ready(
        vgae_forward(x, adj, w1, w2, w3)
    )

    # Sanity check against plain-JAX f32 reference (tolerances account for the
    # bf16 MXU operands inside the kernel).
    ref_h1 = jnp.maximum(adj @ (x @ w1), 0.0)
    ref_mu = adj @ (ref_h1 @ w2)
    ref_lv = adj @ (ref_h1 @ w3)
    ref_adj = ref_mu @ ref_mu.T
    assert hidden1.shape == (N, H1) and mu.shape == (N, H2)
    assert logvar.shape == (N, H2) and adj_rec.shape == (N, N)
    assert z.shape == (N, H2)
    assert jnp.allclose(hidden1, ref_h1, atol=2e-2, rtol=2e-2)
    assert jnp.allclose(mu, ref_mu, atol=2e-2, rtol=2e-2)
    assert jnp.allclose(logvar, ref_lv, atol=2e-2, rtol=2e-2)
    assert jnp.allclose(z, ref_mu, atol=2e-2, rtol=2e-2)
    assert jnp.allclose(adj_rec, ref_adj, atol=2e-2, rtol=2e-2)

    print("KERNEL_OK")
</pallas_src>

<mosaic_0001>
module attributes {stable_mosaic.version = 11 : i64} {
  func.func @_vgae_fused_kernel(%arg0: i32, %arg1: memref<256x64xf32, #tpu.memory_space<vmem>>, %arg2: memref<256x256xf32, #tpu.memory_space<vmem>>, %arg3: memref<64x64xf32, #tpu.memory_space<vmem>>, %arg4: memref<64x64xf32, #tpu.memory_space<vmem>>, %arg5: memref<256x64xf32, #tpu.memory_space<vmem>>, %arg6: memref<256x32xf32, #tpu.memory_space<vmem>>, %arg7: memref<256x32xf32, #tpu.memory_space<vmem>>, %arg8: memref<128x256xf32, #tpu.memory_space<vmem>>, %arg9: memref<256x32xbf16, #tpu.memory_space<vmem>>) attributes {dimension_semantics = [#tpu.dimension_semantics<arbitrary>], iteration_bounds = array<i64: 2>, scalar_prefetch = 0 : i64, scratch_operands = 1 : i64, tpu.core_type = #tpu.core_type<tc>, window_params = [{pipeline_mode = #tpu.pipeline_mode<synchronous>, transform_indices = @transform_0, window_bounds = array<i64: 256, 64>}, {pipeline_mode = #tpu.pipeline_mode<synchronous>, transform_indices = @transform_1, window_bounds = array<i64: 256, 256>}, {pipeline_mode = #tpu.pipeline_mode<synchronous>, transform_indices = @transform_2, window_bounds = array<i64: 64, 64>}, {pipeline_mode = #tpu.pipeline_mode<synchronous>, transform_indices = @transform_3, window_bounds = array<i64: 64, 64>}, {pipeline_mode = #tpu.pipeline_mode<synchronous>, transform_indices = @transform_4, window_bounds = array<i64: 256, 64>}, {pipeline_mode = #tpu.pipeline_mode<synchronous>, transform_indices = @transform_5, window_bounds = array<i64: 256, 32>}, {pipeline_mode = #tpu.pipeline_mode<synchronous>, transform_indices = @transform_6, window_bounds = array<i64: 256, 32>}, {transform_indices = @transform_7, window_bounds = array<i64: 128, 256>}]} {
    %c0_i32 = arith.constant 0 : i32
    %0 = arith.cmpi eq, %arg0, %c0_i32 : i32
    %1 = arith.extui %0 : i1 to i32
    %c0_i32_0 = arith.constant 0 : i32
    %2 = arith.cmpi ne, %1, %c0_i32_0 : i32
    scf.if %2 {
      %c0_5 = arith.constant 0 : index
      %c0_6 = arith.constant 0 : index
      %10 = vector.load %arg2[%c0_5, %c0_6] : memref<256x256xf32, #tpu.memory_space<vmem>>, vector<256x256xf32>
      %11 = arith.truncf %10 : vector<256x256xf32> to vector<256x256xbf16>
      %c0_7 = arith.constant 0 : index
      %c0_8 = arith.constant 0 : index
      %12 = vector.load %arg1[%c0_7, %c0_8] : memref<256x64xf32, #tpu.memory_space<vmem>>, vector<256x64xf32>
      %13 = arith.truncf %12 : vector<256x64xf32> to vector<256x64xbf16>
      %c0_9 = arith.constant 0 : index
      %c0_10 = arith.constant 0 : index
      %14 = vector.load %arg3[%c0_9, %c0_10] : memref<64x64xf32, #tpu.memory_space<vmem>>, vector<64x64xf32>
      %15 = arith.truncf %14 : vector<64x64xf32> to vector<64x64xbf16>
      %cst_11 = arith.constant dense<0.000000e+00> : vector<256x64xf32>
      %16 = tpu.matmul %13, %15, %cst_11 {dimension_numbers = #tpu.dot_dimension_numbers<[1], [0], [0], [1], [0, 0, 1, 1], [], []>} : vector<256x64xbf16>, vector<64x64xbf16>, vector<256x64xf32> -> vector<256x64xf32>
      %17 = arith.truncf %16 : vector<256x64xf32> to vector<256x64xbf16>
      %cst_12 = arith.constant dense<0.000000e+00> : vector<256x64xf32>
      %18 = tpu.matmul %11, %17, %cst_12 {dimension_numbers = #tpu.dot_dimension_numbers<[1], [0], [0], [1], [0, 0, 1, 1], [], []>} : vector<256x256xbf16>, vector<256x64xbf16>, vector<256x64xf32> -> vector<256x64xf32>
      %cst_13 = arith.constant 0.000000e+00 : f32
      %19 = vector.broadcast %cst_13 : f32 to vector<256x64xf32>
      %20 = arith.maximumf %18, %19 : vector<256x64xf32>
      %c0_14 = arith.constant 0 : index
      %c0_15 = arith.constant 0 : index
      %21 = vector.load %arg5[%c0_14, %c0_15] : memref<256x64xf32, #tpu.memory_space<vmem>>, vector<256x64xf32>
      tpu.vector_store %arg5[%c0_14, %c0_15], %20 {strides = array<i32>} : memref<256x64xf32, #tpu.memory_space<vmem>>, vector<256x64xf32>,
      %22 = arith.truncf %20 : vector<256x64xf32> to vector<256x64xbf16>
      %c0_16 = arith.constant 0 : index
      %c0_17 = arith.constant 0 : index
      %23 = vector.load %arg4[%c0_16, %c0_17] : memref<64x64xf32, #tpu.memory_space<vmem>>, vector<64x64xf32>
      %24 = arith.truncf %23 : vector<64x64xf32> to vector<64x64xbf16>
      %cst_18 = arith.constant dense<0.000000e+00> : vector<256x64xf32>
      %25 = tpu.matmul %22, %24, %cst_18 {dimension_numbers = #tpu.dot_dimension_numbers<[1], [0], [0], [1], [0, 0, 1, 1], [], []>} : vector<256x64xbf16>, vector<64x64xbf16>, vector<256x64xf32> -> vector<256x64xf32>
      %26 = arith.truncf %25 : vector<256x64xf32> to vector<256x64xbf16>
      %cst_19 = arith.constant dense<0.000000e+00> : vector<256x64xf32>
      %27 = tpu.matmul %11, %26, %cst_19 {dimension_numbers = #tpu.dot_dimension_numbers<[1], [0], [0], [1], [0, 0, 1, 1], [], []>} : vector<256x256xbf16>, vector<256x64xbf16>, vector<256x64xf32> -> vector<256x64xf32>
      %28 = vector.extract_strided_slice %27 {offsets = [0, 0], sizes = [256, 32], strides = [1, 1]} : vector<256x64xf32> to vector<256x32xf32>
      %c0_20 = arith.constant 0 : index
      %c0_21 = arith.constant 0 : index
      %29 = vector.load %arg6[%c0_20, %c0_21] : memref<256x32xf32, #tpu.memory_space<vmem>>, vector<256x32xf32>
      tpu.vector_store %arg6[%c0_20, %c0_21], %28 {strides = array<i32>} : memref<256x32xf32, #tpu.memory_space<vmem>>, vector<256x32xf32>,
      %30 = vector.extract_strided_slice %27 {offsets = [0, 32], sizes = [256, 32], strides = [1, 1]} : vector<256x64xf32> to vector<256x32xf32>
      %c0_22 = arith.constant 0 : index
      %c0_23 = arith.constant 0 : index
      %31 = vector.load %arg7[%c0_22, %c0_23] : memref<256x32xf32, #tpu.memory_space<vmem>>, vector<256x32xf32>
      tpu.vector_store %arg7[%c0_22, %c0_23], %30 {strides = array<i32>} : memref<256x32xf32, #tpu.memory_space<vmem>>, vector<256x32xf32>,
      %32 = arith.truncf %28 : vector<256x32xf32> to vector<256x32xbf16>
      %c0_24 = arith.constant 0 : index
      %c0_25 = arith.constant 0 : index
      %33 = vector.load %arg9[%c0_24, %c0_25] : memref<256x32xbf16, #tpu.memory_space<vmem>>, vector<256x32xbf16>
      tpu.vector_store %arg9[%c0_24, %c0_25], %32 {strides = array<i32>} : memref<256x32xbf16, #tpu.memory_space<vmem>>, vector<256x32xbf16>,
    } else {
    }
    %c128_i32 = arith.constant 128 : i32
    %3 = arith.muli %arg0, %c128_i32 : i32
    %4 = tpu.assume_multiple %3, 128 : i32
    %5 = arith.index_cast %4 : i32 to index
    %c0 = arith.constant 0 : index
    %6 = vector.load %arg9[%5, %c0] : memref<256x32xbf16, #tpu.memory_space<vmem>>, vector<128x32xbf16>
    %c0_1 = arith.constant 0 : index
    %c0_2 = arith.constant 0 : index
    %7 = vector.load %arg9[%c0_1, %c0_2] : memref<256x32xbf16, #tpu.memory_space<vmem>>, vector<256x32xbf16>
    %cst = arith.constant dense<0.000000e+00> : vector<128x256xf32>
    %8 = tpu.matmul %6, %7, %cst {dimension_numbers = #tpu.dot_dimension_numbers<[1], [1], [0], [0], [0, 0, 1, 0], [], []>} : vector<128x32xbf16>, vector<256x32xbf16>, vector<128x256xf32> -> vector<128x256xf32>
    %c0_3 = arith.constant 0 : index
    %c0_4 = arith.constant 0 : index
    %9 = vector.load %arg8[%c0_3, %c0_4] : memref<128x256xf32, #tpu.memory_space<vmem>>, vector<128x256xf32>
    tpu.vector_store %arg8[%c0_3, %c0_4], %8 {strides = array<i32>} : memref<128x256xf32, #tpu.memory_space<vmem>>, vector<128x256xf32>,
    return
  }
  func.func @transform_0(%arg0: i32) -> (i32, i32) {
    %c0_i32 = arith.constant 0 : i32
    %c0_i32_0 = arith.constant 0 : i32
    %c0_i32_1 = arith.constant 0 : i32
    return %c0_i32, %c0_i32_0 : i32, i32
  }
  func.func @transform_1(%arg0: i32) -> (i32, i32) {
    %c0_i32 = arith.constant 0 : i32
    %c0_i32_0 = arith.constant 0 : i32
    %c0_i32_1 = arith.constant 0 : i32
    return %c0_i32, %c0_i32_0 : i32, i32
  }
  func.func @transform_2(%arg0: i32) -> (i32, i32) {
    %c0_i32 = arith.constant 0 : i32
    %c0_i32_0 = arith.constant 0 : i32
    %c0_i32_1 = arith.constant 0 : i32
    return %c0_i32, %c0_i32_0 : i32, i32
  }
  func.func @transform_3(%arg0: i32) -> (i32, i32) {
    %c0_i32 = arith.constant 0 : i32
    %c0_i32_0 = arith.constant 0 : i32
    %c0_i32_1 = arith.constant 0 : i32
    return %c0_i32, %c0_i32_0 : i32, i32
  }
  func.func @transform_4(%arg0: i32) -> (i32, i32) {
    %c0_i32 = arith.constant 0 : i32
    %c0_i32_0 = arith.constant 0 : i32
    %c0_i32_1 = arith.constant 0 : i32
    return %c0_i32, %c0_i32_0 : i32, i32
  }
  func.func @transform_5(%arg0: i32) -> (i32, i32) {
    %c0_i32 = arith.constant 0 : i32
    %c0_i32_0 = arith.constant 0 : i32
    %c0_i32_1 = arith.constant 0 : i32
    return %c0_i32, %c0_i32_0 : i32, i32
  }
  func.func @transform_6(%arg0: i32) -> (i32, i32) {
    %c0_i32 = arith.constant 0 : i32
    %c0_i32_0 = arith.constant 0 : i32
    %c0_i32_1 = arith.constant 0 : i32
    return %c0_i32, %c0_i32_0 : i32, i32
  }
  func.func @transform_7(%arg0: i32) -> (i32, i32) {
    %c0_i32 = arith.constant 0 : i32
    %c0_i32_0 = arith.constant 0 : i32
    return %arg0, %c0_i32 : i32, i32
  }
}

</mosaic_0001>

<bundles_post_ra>
// kernel: tpu_custom_call.1
= control target key start
LH: loop header
LB: loop body
LE: loop exit
PB: predicated region body
PF: predicated region fallthrough
CT: control target
= control target key end

     0   :  { %13 = vsyncpa [#allocation4], 0  ;;  %s3268_s0 = inlined_call_operand.vmem [shape: f32[256,64], index: 0, kind: input, shape index: {}]   ;;  %s3269_s1 = inlined_call_operand.hbm [shape: f32[256,256], index: 1, kind: input, shape index: {}]   ;;  %s3270_s2 = inlined_call_operand.vmem [shape: f32[64,64], index: 2, kind: input, shape index: {}]   ;;  %s3271_s3 = inlined_call_operand.vmem [shape: f32[64,64], index: 3, kind: input, shape index: {}]   ;;  %s3272_s4 = inlined_call_operand.vmem [shape: f32[256,64], index: 4, kind: output, shape index: {0}]   ;;  %s3273_s5 = inlined_call_operand.vmem [shape: f32[256,32], index: 5, kind: output, shape index: {1}]   ;;  %s3274_s6 = inlined_call_operand.vmem [shape: f32[256,32], index: 6, kind: output, shape index: {2}]   ;;  %s3275_s7 = inlined_call_operand.hbm [shape: f32[256,256], index: 7, kind: output, shape index: {3}]  }
   0x1   :  { %14 = vsyncpa [#allocation5], 0 }
   0x2   :  { %16 = vsyncpa [#allocation5 + $0x1], 0  ;;  %s2324_s24 = smov 0   ;;  %s2326_s25 = smov 0  }
   0x3   :  { %s2328_s26 = smov 0   ;;  %s2330_s27 = smov 0  }
   0x4 LB: > { %s2345_s28 = sadd.s32 4294967295, %s2276_s27   ;;  %s1916_s29 = sadd.s32 4294967294, %s2276_s27   ;;  %s2276_s27 = sphi %s2330_s27, %s3281_s27   ;;  %s2272_s26 = sphi %s2328_s26, %s3280_s26   ;;  %s2268_s25 = sphi %s2326_s25, %s3279_s25   ;;  %s2264_s24 = sphi %s2324_s24, %s3278_s24  }
   0x5   : > { %s2349_s30 = sadd.s32 1, %s2276_s27   ;;  %s176_s8 = sadd.s32 1, %s2272_s26 }
   0x6   : > { %s173_s9 = ssub.s32 %s2276_s27, %s2349_s30  ;;  %p186_p0 = scmp.ne.s32.totalorder %s2272_s26, %s2268_s25 }
   0x7   : > { %p174_p1 = scmp.eq.s32.totalorder %s173_s9, 0  ;;  %p187_p2 = scmp.eq.s32.totalorder %s2345_s28, 1 }
   0x8   : > { %p192_p3 = scmp.ne.s32.totalorder %s2268_s25, %s2264_s24  ;;  %p193_p4 = scmp.eq.s32.totalorder %s1916_s29, 1 }
   0x9   : > { %s2360_s10 = scalar_select %p174_p1, %s2272_s26, %s176_s8  }
   0xa   : > { %p2362_p5 = por %p187_p2, %p186_p0  ;;  %p2366_p6 = por %p193_p4, %p192_p3 }
   0xb   : > { %p1917_p7 = scmp.ge.s32.totalorder %s2276_s27, 1  ;;  %p200_p8 = scmp.lt.s32.totalorder %s2276_s27, 3 }
   0xc   : > { %p1918_p9 = scmp.ne.s32.totalorder %s2345_s28, 0  ;;  %p2139_p10 = scmp.eq.s32.totalorder %s2345_s28, 0 }
   0xd   : > { %p201_p11 = pnand %p1917_p7, %p200_p8  ;;  %s214_s15 = sshll.u32 %s3269_s1, 4  ;;  %s215_s15 = int_to_ptr.hbm [resolvable:$true] %s214_s15 }
   0xe   : > { %s2278_s16 = smov [#allocation3]   ;;  %s2279_s18 = smov 256  }
   0xf   : > { %p2131_p12 = pneg %p201_p11  ;;  %s216_s17 = sshll.u32 %s2278_s16, 4  ;;  %s217_s17 = int_to_ptr.vmem [resolvable:$true] %s216_s17 }
  0x10   : > { %s2280_s19 = smov 16   ;;  %238 = sbr.rel (%p201_p11) target bundleno = 1633 (0x661), region = 36 }
  0x11   : > { %p2132_p13 = pnand %p2139_p10, %p2131_p12 }
  0x13   : > { %2134 = dma.hbm_to_vmem [thread:$0]  (!%p2132_p13), %s215_s15, 8192, %s217_s17, [#allocation4], %s2279_s18, %s2279_s18, %s2280_s19  }
  0x15   : > { %2255 = dma.done.wait (%p2139_p10), [#allocation4], 8192  }
  0x16   : > { %2257 = vsyncadd (%p2139_p10), [#allocation4], 4294959104  ;;  %s263_s20 = sand.u32 1, %s2268_s25   ;;  %271 = sbr.rel (%p1918_p9) target bundleno = 1375 (0x55f), region = 44 }
  0x17   : > { %s1921_s21 = sshll.u32 %s263_s20, 8  ;;  %s2281_s15 = smov (!%p1918_p9), 96  }
  0x18   : > { %s2386_s22 = scalar_lea.vmem [#allocation6], %s1921_s21 }
  0x1b   : > { %v422_v0 = vld [vmem:[%s3270_s2 + $0x30] sm:$0xff]  ;;  %v423_v1 = vld [vmem:[%s3270_s2 + $0x38] sm:$0xff]  ;;  %v420_v2 = vld [vmem:[%s3270_s2 + $0x20] sm:$0xff]  ;;  %vm428_vm0 = vcmask 523264   ;;  %vm1183_vm1 = vcmask 261120   ;;  %vm1408_vm2 = vcmask 257024  }
  0x1c   : > { %v427_v3 = vpack.c.bf16 %v423_v1, %v422_v0  ;;  %v421_v4 = vld [vmem:[%s3270_s2 + $0x28] sm:$0xff]  ;;  %v418_v6 = vld [vmem:[%s3270_s2 + $0x10] sm:$0xff]  ;;  %v419_v7 = vld [vmem:[%s3270_s2 + $0x18] sm:$0xff] }
  0x1d   : > { %v426_v5 = vpack.c.bf16 %v421_v4, %v420_v2  ;;  %v425_v8 = vpack.c.bf16 %v419_v7, %v418_v6  ;;  %v416_v9 = vld [vmem:[%s3270_s2] sm:$0xff]  ;;  %v417_v10 = vld [vmem:[%s3270_s2 + $0x8] sm:$0xff]  ;;  %v386_v14 = vld [vmem:[%s3268_s0 + $0x90] sm:$0xff] }
  0x1e   : > { %481 = vmatpush.bf16.msra.mxu0 %v427_v3  ;;  %2101 = vmatpush.bf16.msra.mxu1 %v427_v3  ;;  %v368_v11 = vld [vmem:[%s3268_s0] sm:$0xff]  ;;  %v424_v12 = vpack.c.bf16 %v417_v10, %v416_v9  ;;  %v369_v13 = vld [vmem:[%s3268_s0 + $0x8] sm:$0xff]  ;;  %v387_v15 = vld [vmem:[%s3268_s0 + $0x98] sm:$0xff] }
  0x1f   : > { %v400_v16 = vpack.c.bf16 %v369_v13, %v368_v11  ;;  %v409_v17 = vpack.c.bf16 %v387_v15, %v386_v14  ;;  %v370_v18 = vld [vmem:[%s3268_s0 + $0x10] sm:$0xff]  ;;  %v371_v19 = vld [vmem:[%s3268_s0 + $0x18] sm:$0xff]  ;;  %v388_v20 = vld [vmem:[%s3268_s0 + $0xa0] sm:$0xff] }
  0x20   : > { %v389_v21 = vld [vmem:[%s3268_s0 + $0xa8] sm:$0xff]  ;;  %v401_v22 = vpack.c.bf16 %v371_v19, %v370_v18  ;;  %v372_v24 = vld [vmem:[%s3268_s0 + $0x20] sm:$0xff]  ;;  %v390_v26 = vld [vmem:[%s3268_s0 + $0xb0] sm:$0xff] }
  0x21   : > { %v410_v23 = vpack.c.bf16 %v389_v21, %v388_v20  ;;  %v373_v25 = vld [vmem:[%s3268_s0 + $0x28] sm:$0xff]  ;;  %v391_v27 = vld [vmem:[%s3268_s0 + $0xb8] sm:$0xff]  ;;  %v374_v30 = vld [vmem:[%s3268_s0 + $0x30] sm:$0xff] }
  0x22   : > { %482 = vmatpush.bf16.msra.mxu0 %v426_v5  ;;  %2102 = vmatpush.bf16.msra.mxu1 %v426_v5  ;;  %v402_v28 = vpack.c.bf16 %v373_v25, %v372_v24  ;;  %v411_v29 = vpack.c.bf16 %v391_v27, %v390_v26  ;;  %v375_v31 = vld [vmem:[%s3268_s0 + $0x38] sm:$0xff]  ;;  %v392_v32 = vld [vmem:[%s3268_s0 + $0xc0] sm:$0xff]  ;;  %v393_v33 = vld [vmem:[%s3268_s0 + $0xc8] sm:$0xff] }
  0x23   : > { %v403_v34 = vpack.c.bf16 %v375_v31, %v374_v30  ;;  %v412_v35 = vpack.c.bf16 %v393_v33, %v392_v32  ;;  %v376_v36 = vld [vmem:[%s3268_s0 + $0x40] sm:$0xff]  ;;  %v377_v37 = vld [vmem:[%s3268_s0 + $0x48] sm:$0xff]  ;;  %v394_v38 = vld [vmem:[%s3268_s0 + $0xd0] sm:$0xff] }
  0x24   : > { %v395_v39 = vld [vmem:[%s3268_s0 + $0xd8] sm:$0xff]  ;;  %v404_v40 = vpack.c.bf16 %v377_v37, %v376_v36  ;;  %v378_v42 = vld [vmem:[%s3268_s0 + $0x50] sm:$0xff]  ;;  %v396_v44 = vld [vmem:[%s3268_s0 + $0xe0] sm:$0xff] }
  0x25   : > { %v413_v41 = vpack.c.bf16 %v395_v39, %v394_v38  ;;  %v379_v43 = vld [vmem:[%s3268_s0 + $0x58] sm:$0xff]  ;;  %v397_v45 = vld [vmem:[%s3268_s0 + $0xe8] sm:$0xff]  ;;  %v380_v48 = vld [vmem:[%s3268_s0 + $0x60] sm:$0xff] }
  0x26   : > { %483 = vmatpush.bf16.msra.mxu0 %v425_v8  ;;  %2103 = vmatpush.bf16.msra.mxu1 %v425_v8  ;;  %v405_v46 = vpack.c.bf16 %v379_v43, %v378_v42  ;;  %v414_v47 = vpack.c.bf16 %v397_v45, %v396_v44  ;;  %v381_v49 = vld [vmem:[%s3268_s0 + $0x68] sm:$0xff]  ;;  %v398_v50 = vld [vmem:[%s3268_s0 + $0xf0] sm:$0xff]  ;;  %v399_v51 = vld [vmem:[%s3268_s0 + $0xf8] sm:$0xff] }
  0x27   : > { %v406_v52 = vpack.c.bf16 %v381_v49, %v380_v48  ;;  %v415_v53 = vpack.c.bf16 %v399_v51, %v398_v50  ;;  %v382_v54 = vld [vmem:[%s3268_s0 + $0x70] sm:$0xff]  ;;  %v383_v55 = vld [vmem:[%s3268_s0 + $0x78] sm:$0xff]  ;;  %v384_v57 = vld [vmem:[%s3268_s0 + $0x80] sm:$0xff] }
  0x28   : > { %v407_v56 = vpack.c.bf16 %v383_v55, %v382_v54  ;;  %v385_v58 = vld [vmem:[%s3268_s0 + $0x88] sm:$0xff]  ;;  %v275_v39 = vld [vmem:[#allocation3 + $0x18] sm:$0xff]  ;;  %v278_v54 = vld [vmem:[#allocation3 + $0x30] sm:$0xff] }
  0x29   : > { %v408_v59 = vpack.c.bf16 %v385_v58, %v384_v57  ;;  %v273_v38 = vld [vmem:[#allocation3 + $0x8] sm:$0xff]  ;;  %v279_v51 = vld [vmem:[#allocation3 + $0x38] sm:$0xff] }
  0x2a   : > { %484 = vmatpush.bf16.msra.mxu0 %v424_v12  ;;  %2104 = vmatpush.bf16.msra.mxu1 %v424_v12  ;;  %v2530_v43 = vpack.c.bf16 %v275_v39, %v273_v38  ;;  %v277_v50 = vld [vmem:[#allocation3 + $0x28] sm:$0xff]  ;;  %v283_v57 = vld [vmem:[#allocation3 + $0x58] sm:$0xff] }
  0x2b   : > { %v309_v39 = vld [vmem:[#allocation3 + $0x128] sm:$0xff] }
  0x2d   : > { %1923 = vmatmul.msk.bf16.vlgmr.msra.gmra.mxu0 %vm428_vm0, %v400_v16  ;;  %1932 = vmatmul.msk.bf16.vlgmr.msra.gmra.mxu1 %vm428_vm0, %v409_v17 }
  0x3d   : > { %1924 = vmatmul.msk.bf16.gmra.mxu0 %vm428_vm0, %v401_v22  ;;  %1933 = vmatmul.msk.bf16.gmra.mxu1 %vm428_vm0, %v410_v23 }
  0x4d   : > { %1925 = vmatmul.msk.bf16.gmra.mxu0 %vm428_vm0, %v402_v28  ;;  %1934 = vmatmul.msk.bf16.gmra.mxu1 %vm428_vm0, %v411_v29 }
  0x5d   : > { %1926 = vmatmul.msk.bf16.gmra.mxu0 %vm428_vm0, %v403_v34  ;;  %1935 = vmatmul.msk.bf16.gmra.mxu1 %vm428_vm0, %v412_v35 }
  0x6d   : > { %1927 = vmatmul.msk.bf16.gmra.mxu0 %vm428_vm0, %v404_v40  ;;  %1936 = vmatmul.msk.bf16.gmra.mxu1 %vm428_vm0, %v413_v41 }
  0x7d   : > { %1928 = vmatmul.msk.bf16.gmra.mxu0 %vm428_vm0, %v405_v46  ;;  %1937 = vmatmul.msk.bf16.gmra.mxu1 %vm428_vm0, %v414_v47  ;;  %v272_v46 = vld [vmem:[#allocation3] sm:$0xff]  ;;  %v274_v47 = vld [vmem:[#allocation3 + $0x10] sm:$0xff] }
  0x7e   : > { %v2535_v49 = vpack.c.bf16 %v274_v47, %v272_v46 }
  0x8d   : > { %1929 = vmatmul.msk.bf16.gmra.mxu0 %vm428_vm0, %v406_v52  ;;  %1938 = vmatmul.msk.bf16.gmra.mxu1 %vm428_vm0, %v415_v53  ;;  %v2538_v52 = vpack.c.bf16 %v279_v51, %v277_v50  ;;  %v276_v53 = vld [vmem:[#allocation3 + $0x20] sm:$0xff] }
  0x8e   : > { %v2541_v55 = vpack.c.bf16 %v278_v54, %v276_v53  ;;  %v308_v51 = vld [vmem:[#allocation3 + $0x120] sm:$0xff]  ;;  %v310_v53 = vld [vmem:[#allocation3 + $0x130] sm:$0xff] }
  0x9d   : > { %1930 = vmatmul.msk.bf16.gmra.mxu0 %vm428_vm0, %v407_v56  ;;  %v281_v56 = vld [vmem:[#allocation3 + $0x48] sm:$0xff] }
  0x9e   : > { %v2544_v58 = vpack.c.bf16 %v283_v57, %v281_v56  ;;  %v2605_v56 = vpack.c.bf16 %v310_v53, %v308_v51  ;;  %v320_v51 = vld [vmem:[#allocation3 + $0x180] sm:$0xff]  ;;  %v322_v53 = vld [vmem:[#allocation3 + $0x190] sm:$0xff] }
  0xaa   : > { %v2525_v60 = vpop.f32.mrf.mxu0  ;;  %v531_v61 = vpop.f32.mrf.mxu1 }
  0xad   : > { %1931 = vmatmul.msk.bf16.gmra.mxu0 %vm428_vm0, %v408_v59  ;;  %v280_v59 = vld [vmem:[#allocation3 + $0x40] sm:$0xff] }
  0xb2   : > { %v2528_v62 = vpop.f32.mrf.mxu0  ;;  %v533_v63 = vpop.f32.mrf.mxu1 }
  0xb3   : > { %v575_v36 = vpack.c.bf16 %v533_v63, %v531_v61  ;;  %v566_v48 = vpack.c.bf16 %v2528_v62, %v2525_v60  ;;  %v282_v60 = vld [vmem:[#allocation3 + $0x50] sm:$0xff]  ;;  %v285_v62 = vld [vmem:[#allocation3 + $0x68] sm:$0xff]  ;;  %v287_v63 = vld [vmem:[#allocation3 + $0x78] sm:$0xff] }
  0xb4   : > { %v2547_v61 = vpack.c.bf16 %v282_v60, %v280_v59  ;;  %v313_v59 = vld [vmem:[#allocation3 + $0x148] sm:$0xff]  ;;  %v315_v60 = vld [vmem:[#allocation3 + $0x158] sm:$0xff] }
  0xba   : > { %v491_v0 = vpop.f32.mrf.mxu0  ;;  %v536_v1 = vpop.f32.mrf.mxu1 }
  0xc2   : > { %v493_v2 = vpop.f32.mrf.mxu0  ;;  %v538_v3 = vpop.f32.mrf.mxu1 }
  0xc3   : > { %v576_v33 = vpack.c.bf16 %v538_v3, %v536_v1  ;;  %v567_v45 = vpack.c.bf16 %v493_v2, %v491_v0  ;;  %v2550_v0 = vpack.c.bf16 %v287_v63, %v285_v62  ;;  %v284_v1 = vld [vmem:[#allocation3 + $0x60] sm:$0xff]  ;;  %v286_v2 = vld [vmem:[#allocation3 + $0x70] sm:$0xff] }
  0xc4   : > { %v2553_v3 = vpack.c.bf16 %v286_v2, %v284_v1  ;;  %v2608_v2 = vpack.c.bf16 %v315_v60, %v313_v59  ;;  %v844_v59 = vld [vmem:[%s3271_s3 + $0x20] sm:$0xff]  ;;  %v845_v60 = vld [vmem:[%s3271_s3 + $0x28] sm:$0xff] }
  0xca   : > { %v496_v4 = vpop.f32.mrf.mxu0  ;;  %v541_v5 = vpop.f32.mrf.mxu1 }
  0xd2   : > { %v498_v6 = vpop.f32.mrf.mxu0  ;;  %v543_v7 = vpop.f32.mrf.mxu1 }
  0xd3   : > { %v577_v31 = vpack.c.bf16 %v543_v7, %v541_v5  ;;  %v568_v44 = vpack.c.bf16 %v498_v6, %v496_v4  ;;  %v289_v4 = vld [vmem:[#allocation3 + $0x88] sm:$0xff]  ;;  %v291_v5 = vld [vmem:[#allocation3 + $0x98] sm:$0xff]  ;;  %v288_v7 = vld [vmem:[#allocation3 + $0x80] sm:$0xff] }
  0xd4   : > { %v2556_v6 = vpack.c.bf16 %v291_v5, %v289_v4 }
  0xda   : > { %v501_v8 = vpop.f32.mrf.mxu0  ;;  %v546_v9 = vpop.f32.mrf.mxu1 }
  0xe2   : > { %v503_v10 = vpop.f32.mrf.mxu0  ;;  %v548_v11 = vpop.f32.mrf.mxu1 }
  0xe3   : > { %v578_v28 = vpack.c.bf16 %v548_v11, %v546_v9  ;;  %v569_v41 = vpack.c.bf16 %v503_v10, %v501_v8  ;;  %v290_v8 = vld [vmem:[#allocation3 + $0x90] sm:$0xff]  ;;  %v293_v10 = vld [vmem:[#allocation3 + $0xa8] sm:$0xff]  ;;  %v295_v11 = vld [vmem:[#allocation3 + $0xb8] sm:$0xff] }
  0xe4   : > { %v2559_v9 = vpack.c.bf16 %v290_v8, %v288_v7 }
  0xea   : > { %v506_v12 = vpop.f32.mrf.mxu0  ;;  %v551_v13 = vpop.f32.mrf.mxu1 }
  0xf2   : > { %v508_v14 = vpop.f32.mrf.mxu0  ;;  %v553_v15 = vpop.f32.mrf.mxu1 }
  0xf3   : > { %v579_v27 = vpack.c.bf16 %v553_v15, %v551_v13  ;;  %v570_v37 = vpack.c.bf16 %v508_v14, %v506_v12  ;;  %v2562_v12 = vpack.c.bf16 %v295_v11, %v293_v10  ;;  %v292_v13 = vld [vmem:[#allocation3 + $0xa0] sm:$0xff]  ;;  %v294_v14 = vld [vmem:[#allocation3 + $0xb0] sm:$0xff] }
  0xf4   : > { %v2565_v15 = vpack.c.bf16 %v294_v14, %v292_v13  ;;  %v312_v10 = vld [vmem:[#allocation3 + $0x140] sm:$0xff]  ;;  %v314_v11 = vld [vmem:[#allocation3 + $0x150] sm:$0xff] }
  0xf5   : > { %v2621_v14 = vpack.c.bf16 %v314_v11, %v312_v10 }
  0xfa   : > { %v511_v16 = vpop.f32.mrf.mxu0  ;;  %v556_v17 = vpop.f32.mrf.mxu1 }
 0x102   : > { %v513_v18 = vpop.f32.mrf.mxu0  ;;  %v558_v19 = vpop.f32.mrf.mxu1 }
 0x103   : > { %v580_v25 = vpack.c.bf16 %v558_v19, %v556_v17  ;;  %v571_v35 = vpack.c.bf16 %v513_v18, %v511_v16  ;;  %v297_v16 = vld [vmem:[#allocation3 + $0xc8] sm:$0xff]  ;;  %v299_v17 = vld [vmem:[#allocation3 + $0xd8] sm:$0xff]  ;;  %v296_v19 = vld [vmem:[#allocation3 + $0xc0] sm:$0xff] }
 0x104   : > { %v2568_v18 = vpack.c.bf16 %v299_v17, %v297_v16  ;;  %v317_v17 = vld [vmem:[#allocation3 + $0x168] sm:$0xff] }
 0x10a   : > { %v516_v20 = vpop.f32.mrf.mxu0  ;;  %v561_v21 = vpop.f32.mrf.mxu1 }
 0x112   : > { %v518_v22 = vpop.f32.mrf.mxu0  ;;  %v563_v23 = vpop.f32.mrf.mxu1 }
 0x113   : > { %v581_v24 = vpack.c.bf16 %v563_v23, %v561_v21  ;;  %v572_v32 = vpack.c.bf16 %v518_v22, %v516_v20  ;;  %v298_v20 = vld [vmem:[#allocation3 + $0xd0] sm:$0xff]  ;;  %v301_v22 = vld [vmem:[#allocation3 + $0xe8] sm:$0xff]  ;;  %v303_v23 = vld [vmem:[#allocation3 + $0xf8] sm:$0xff] }
 0x114   : > { %v2571_v21 = vpack.c.bf16 %v298_v20, %v296_v19  ;;  %v319_v19 = vld [vmem:[#allocation3 + $0x178] sm:$0xff] }
 0x115   : > { %671 = vmatpush.bf16.msra.mxu2 %v581_v24  ;;  %v2574_v24 = vpack.c.bf16 %v303_v23, %v301_v22 }
 0x119   : > { %672 = vmatpush.bf16.msra.mxu2 %v580_v25  ;;  %v300_v25 = vld [vmem:[#allocation3 + $0xe0] sm:$0xff] }
 0x11a   : > { %v521_v26 = vpop.f32.mrf.mxu0 }
 0x11d   : > { %673 = vmatpush.bf16.msra.mxu2 %v579_v27 }
 0x121   : > { %674 = vmatpush.bf16.msra.mxu2 %v578_v28  ;;  %v305_v28 = vld [vmem:[#allocation3 + $0x108] sm:$0xff] }
 0x122   : > { %v523_v29 = vpop.f32.mrf.mxu0 }
 0x123   : > { %v573_v30 = vpack.c.bf16 %v523_v29, %v521_v26  ;;  %v302_v26 = vld [vmem:[#allocation3 + $0xf0] sm:$0xff]  ;;  %v307_v29 = vld [vmem:[#allocation3 + $0x118] sm:$0xff] }
 0x124   : > { %v2577_v27 = vpack.c.bf16 %v302_v26, %v300_v25  ;;  %v2624_v25 = vpack.c.bf16 %v319_v19, %v317_v17 }
 0x125   : > { %582 = vmatpush.bf16.msrb.mxu1 %v573_v30  ;;  %675 = vmatpush.bf16.msra.mxu2 %v577_v31  ;;  %v2580_v30 = vpack.c.bf16 %v307_v29, %v305_v28 }
 0x129   : > { %583 = vmatpush.bf16.msrb.mxu1 %v572_v32  ;;  %676 = vmatpush.bf16.msra.mxu2 %v576_v33  ;;  %v304_v32 = vld [vmem:[#allocation3 + $0x100] sm:$0xff]  ;;  %v306_v33 = vld [vmem:[#allocation3 + $0x110] sm:$0xff] }
 0x12a   : > { %v526_v34 = vpop.f32.mrf.mxu0 }
 0x12d   : > { %584 = vmatpush.bf16.msrb.mxu1 %v571_v35  ;;  %677 = vmatpush.bf16.msra.mxu2 %v575_v36  ;;  %v847_v35 = vld [vmem:[%s3271_s3 + $0x38] sm:$0xff] }
 0x131   : > { %585 = vmatpush.bf16.msrb.mxu1 %v570_v37  ;;  %v2589_v37 = vpack.c.bf16 %v306_v33, %v304_v32  ;;  %v316_v32 = vld [vmem:[#allocation3 + $0x160] sm:$0xff]  ;;  %v318_v33 = vld [vmem:[#allocation3 + $0x170] sm:$0xff] }
 0x132   : > { %v528_v40 = vpop.f32.mrf.mxu0 }
 0x133   : > { %v574_v42 = vpack.c.bf16 %v528_v40, %v526_v34  ;;  %v846_v34 = vld [vmem:[%s3271_s3 + $0x30] sm:$0xff]  ;;  %v311_v40 = vld [vmem:[#allocation3 + $0x138] sm:$0xff] }
 0x134   : > { %v851_v36 = vpack.c.bf16 %v847_v35, %v846_v34  ;;  %v2637_v35 = vpack.c.bf16 %v318_v33, %v316_v32 }
 0x135   : > { %586 = vmatpush.bf16.msrb.mxu1 %v569_v41  ;;  %678 = vmatpush.bf16.msra.mxu2 %v574_v42 }
 0x136   : > { %2105 = vmatpush.bf16.msra.mxu3 %v851_v36 }
 0x138   : > { %679 = vmatmul.bf16.vlgmr.msra.gmra.mxu2 %v2530_v43 }
 0x139   : > { %587 = vmatpush.bf16.msrb.mxu1 %v568_v44  ;;  %904 = vmatpush.bf16.msrb.mxu2 %v851_v36 }
 0x13d   : > { %588 = vmatpush.bf16.msrb.mxu1 %v567_v45  ;;  %v2592_v45 = vpack.c.bf16 %v311_v40, %v309_v39  ;;  %v323_v39 = vld [vmem:[#allocation3 + $0x198] sm:$0xff] }
 0x141   : > { %589 = vmatpush.bf16.msrb.mxu1 %v566_v48 }
 0x144   : > { %590 = vmatmul.bf16.vlgmr.msrb.gmra.mxu1 %v2535_v49 }
 0x148   : > { %684 = vmatmul.bf16.gmra.mxu2 %v2538_v52 }
 0x154   : > { %595 = vmatmul.bf16.gmra.mxu1 %v2541_v55 }
 0x158   : > { %689 = vmatmul.bf16.gmra.mxu2 %v2544_v58 }
 0x164   : > { %600 = vmatmul.bf16.gmra.mxu1 %v2547_v61 }
 0x168   : > { %694 = vmatmul.bf16.gmra.mxu2 %v2550_v0 }
 0x174   : > { %605 = vmatmul.bf16.gmra.mxu1 %v2553_v3 }
 0x178   : > { %699 = vmatmul.bf16.gmra.mxu2 %v2556_v6 }
 0x184   : > { %610 = vmatmul.bf16.gmra.mxu1 %v2559_v9 }
 0x188   : > { %704 = vmatmul.bf16.gmra.mxu2 %v2562_v12 }
 0x194   : > { %615 = vmatmul.bf16.gmra.mxu1 %v2565_v15 }
 0x198   : > { %709 = vmatmul.bf16.gmra.mxu2 %v2568_v18 }
 0x1a4   : > { %620 = vmatmul.bf16.gmra.mxu1 %v2571_v21 }
 0x1a8   : > { %714 = vmatmul.bf16.gmra.mxu2 %v2574_v24 }
 0x1b4   : > { %625 = vmatmul.bf16.gmra.mxu1 %v2577_v27 }
 0x1b8   : > { %719 = vmatmul.bf16.gmra.mxu2 %v2580_v30 }
 0x1bb   : > { %v680_v31 = vpop.f32.mrf.mxu2 }
 0x1c1   : > { %v591_v38 = vpop.f32.mrf.mxu1 }
 0x1c2   : > { %v681_v41 = vadd.f32 %v680_v31, %v591_v38  ;;  %v321_v38 = vld [vmem:[#allocation3 + $0x188] sm:$0xff] }
 0x1c3   : > { %v682_v42 = vpop.f32.mrf.mxu2 }
 0x1c4   : > { %v760_v44 = vmax.f32 %v681_v41, 0.0  ;;  %630 = vmatmul.bf16.gmra.mxu1 %v2589_v37 }
 0x1c6   : > { %792 = vst.msk [vmem:[%s3272_s4] sm:$0xff] %vm428_vm0, %v760_v44 }
 0x1c8   : > { %724 = vmatmul.bf16.gmra.mxu2 %v2592_v45 }
 0x1c9   : > { %v593_v46 = vpop.f32.mrf.mxu1 }
 0x1ca   : > { %v683_v47 = vadd.f32 %v682_v42, %v593_v46 }
 0x1cb   : > { %v685_v48 = vpop.f32.mrf.mxu2 }
 0x1cc   : > { %v761_v50 = vmax.f32 %v683_v47, 0.0 }
 0x1ce   : > { %793 = vst.msk [vmem:[%s3272_s4 + $0x8] sm:$0xff] %vm428_vm0, %v761_v50  ;;  %v2603_v54 = vpack.c.bf16 %v761_v50, %v760_v44  ;;  %v2640_v44 = vpack.c.bf16 %v323_v39, %v321_v38  ;;  %v331_v38 = vld [vmem:[#allocation3 + $0x1d8] sm:$0xff] }
 0x1d1   : > { %v596_v57 = vpop.f32.mrf.mxu1 }
 0x1d2   : > { %v686_v62 = vadd.f32 %v685_v48, %v596_v57 }
 0x1d3   : > { %v687_v63 = vpop.f32.mrf.mxu2 }
 0x1d4   : > { %v762_v1 = vmax.f32 %v686_v62, 0.0  ;;  %635 = vmatmul.bf16.gmra.mxu1 %v2605_v56  ;;  %v850_v62 = vpack.c.bf16 %v845_v60, %v844_v59  ;;  %v328_v60 = vld [vmem:[#allocation3 + $0x1c0] sm:$0xff] }
 0x1d6   : > { %794 = vst.msk [vmem:[%s3272_s4 + $0x10] sm:$0xff] %vm428_vm0, %v762_v1  ;;  %905 = vmatpush.bf16.msrb.mxu2 %v850_v62  ;;  %2106 = vmatpush.bf16.msra.mxu3 %v850_v62  ;;  %v330_v62 = vld [vmem:[#allocation3 + $0x1d0] sm:$0xff] }
 0x1d8   : > { %729 = vmatmul.bf16.gmra.mxu2 %v2608_v2 }
 0x1d9   : > { %v598_v4 = vpop.f32.mrf.mxu1 }
 0x1da   : > { %v688_v5 = vadd.f32 %v687_v63, %v598_v4  ;;  %v2659_v63 = vpack.c.bf16 %v322_v53, %v320_v51  ;;  %v325_v4 = vld [vmem:[#allocation3 + $0x1a8] sm:$0xff] }
 0x1db   : > { %v690_v7 = vpop.f32.mrf.mxu2 }
 0x1dc   : > { %v763_v8 = vmax.f32 %v688_v5, 0.0  ;;  %v327_v5 = vld [vmem:[#allocation3 + $0x1b8] sm:$0xff] }
 0x1dd   : > { %v2662_v11 = vpack.c.bf16 %v327_v5, %v325_v4  ;;  %v2703_v4 = vpack.c.bf16 %v330_v62, %v328_v60 }
 0x1de   : > { %795 = vst.msk [vmem:[%s3272_s4 + $0x18] sm:$0xff] %vm428_vm0, %v763_v8  ;;  %v2619_v13 = vpack.c.bf16 %v763_v8, %v762_v1 }
 0x1e1   : > { %v601_v16 = vpop.f32.mrf.mxu1 }
 0x1e2   : > { %v691_v20 = vadd.f32 %v690_v7, %v601_v16 }
 0x1e3   : > { %v692_v22 = vpop.f32.mrf.mxu2 }
 0x1e4   : > { %v764_v23 = vmax.f32 %v691_v20, 0.0  ;;  %640 = vmatmul.bf16.gmra.mxu1 %v2621_v14 }
 0x1e6   : > { %796 = vst.msk [vmem:[%s3272_s4 + $0x20] sm:$0xff] %vm428_vm0, %v764_v23 }
 0x1e8   : > { %734 = vmatmul.bf16.gmra.mxu2 %v2624_v25 }
 0x1e9   : > { %v603_v26 = vpop.f32.mrf.mxu1 }
 0x1ea   : > { %v693_v28 = vadd.f32 %v692_v22, %v603_v26  ;;  %v324_v22 = vld [vmem:[#allocation3 + $0x1a0] sm:$0xff] }
 0x1eb   : > { %v695_v29 = vpop.f32.mrf.mxu2 }
 0x1ec   : > { %v765_v31 = vmax.f32 %v693_v28, 0.0  ;;  %v842_v28 = vld [vmem:[%s3271_s3 + $0x10] sm:$0xff] }
 0x1ee   : > { %797 = vst.msk [vmem:[%s3272_s4 + $0x28] sm:$0xff] %vm428_vm0, %v765_v31  ;;  %v2635_v34 = vpack.c.bf16 %v765_v31, %v764_v23  ;;  %v326_v23 = vld [vmem:[#allocation3 + $0x1b0] sm:$0xff] }
 0x1ef   : > { %v2681_v32 = vpack.c.bf16 %v326_v23, %v324_v22 }
 0x1f1   : > { %v606_v36 = vpop.f32.mrf.mxu1 }
 0x1f2   : > { %v696_v40 = vadd.f32 %v695_v29, %v606_v36  ;;  %v843_v29 = vld [vmem:[%s3271_s3 + $0x18] sm:$0xff]  ;;  %v329_v36 = vld [vmem:[#allocation3 + $0x1c8] sm:$0xff] }
 0x1f3   : > { %v697_v41 = vpop.f32.mrf.mxu2  ;;  %v849_v31 = vpack.c.bf16 %v843_v29, %v842_v28  ;;  %v332_v29 = vld [vmem:[#allocation3 + $0x1e0] sm:$0xff] }
 0x1f4   : > { %v766_v42 = vmax.f32 %v696_v40, 0.0  ;;  %645 = vmatmul.bf16.gmra.mxu1 %v2637_v35  ;;  %v840_v40 = vld [vmem:[%s3271_s3] sm:$0xff] }
 0x1f5   : > { %906 = vmatpush.bf16.msrb.mxu2 %v849_v31  ;;  %2107 = vmatpush.bf16.msra.mxu3 %v849_v31  ;;  %v334_v31 = vld [vmem:[#allocation3 + $0x1f0] sm:$0xff] }
 0x1f6   : > { %798 = vst.msk [vmem:[%s3272_s4 + $0x30] sm:$0xff] %vm428_vm0, %v766_v42 }
 0x1f8   : > { %739 = vmatmul.bf16.gmra.mxu2 %v2640_v44 }
 0x1f9   : > { %v608_v46 = vpop.f32.mrf.mxu1 }
 0x1fa   : > { %v698_v47 = vadd.f32 %v697_v41, %v608_v46  ;;  %v841_v41 = vld [vmem:[%s3271_s3 + $0x8] sm:$0xff] }
 0x1fb   : > { %v700_v48 = vpop.f32.mrf.mxu2  ;;  %v848_v46 = vpack.c.bf16 %v841_v41, %v840_v40 }
 0x1fc   : > { %v767_v50 = vmax.f32 %v698_v47, 0.0 }
 0x1fd   : > { %907 = vmatpush.bf16.msrb.mxu2 %v848_v46  ;;  %2108 = vmatpush.bf16.msra.mxu3 %v848_v46 }
 0x1fe   : > { %799 = vst.msk [vmem:[%s3272_s4 + $0x38] sm:$0xff] %vm428_vm0, %v767_v50  ;;  %v2651_v57 = vpack.c.bf16 %v767_v50, %v766_v42 }
 0x201   : > { %v611_v1 = vpop.f32.mrf.mxu1 }
 0x202   : > { %v701_v7 = vadd.f32 %v700_v48, %v611_v1  ;;  %v2690_v48 = vpack.c.bf16 %v331_v38, %v329_v36  ;;  %v2719_v36 = vpack.c.bf16 %v334_v31, %v332_v29 }
 0x203   : > { %v702_v8 = vpop.f32.mrf.mxu2 }
 0x204   : > { %v768_v10 = vmax.f32 %v701_v7, 0.0  ;;  %650 = vmatmul.bf16.gmra.mxu1 %v2659_v63  ;;  %v333_v7 = vld [vmem:[#allocation3 + $0x1e8] sm:$0xff] }
 0x206   : > { %800 = vst.msk [vmem:[%s3272_s4 + $0x40] sm:$0xff] %vm428_vm0, %v768_v10 }
 0x208   : > { %744 = vmatmul.bf16.gmra.mxu2 %v2662_v11 }
 0x209   : > { %v613_v16 = vpop.f32.mrf.mxu1 }
 0x20a   : > { %v703_v17 = vadd.f32 %v702_v8, %v613_v16  ;;  %v335_v8 = vld [vmem:[#allocation3 + $0x1f8] sm:$0xff] }
 0x20b   : > { %v705_v19 = vpop.f32.mrf.mxu2 }
 0x20c   : > { %v769_v20 = vmax.f32 %v703_v17, 0.0 }
 0x20e   : > { %801 = vst.msk [vmem:[%s3272_s4 + $0x48] sm:$0xff] %vm428_vm0, %v769_v20  ;;  %v2673_v26 = vpack.c.bf16 %v769_v20, %v768_v10 }
 0x211   : > { %v616_v33 = vpop.f32.mrf.mxu1 }
 0x212   : > { %v706_v39 = vadd.f32 %v705_v19, %v616_v33  ;;  %v2706_v19 = vpack.c.bf16 %v335_v8, %v333_v7 }
 0x213   : > { %v707_v42 = vpop.f32.mrf.mxu2 }
 0x214   : > { %v770_v47 = vmax.f32 %v706_v39, 0.0  ;;  %655 = vmatmul.bf16.gmra.mxu1 %v2681_v32 }
 0x216   : > { %802 = vst.msk [vmem:[%s3272_s4 + $0x50] sm:$0xff] %vm428_vm0, %v770_v47 }
 0x218   : > { %749 = vmatmul.bf16.gmra.mxu2 %v2690_v48 }
 0x219   : > { %v618_v50 = vpop.f32.mrf.mxu1 }
 0x21a   : > { %v708_v51 = vadd.f32 %v707_v42, %v618_v50 }
 0x21b   : > { %v710_v53 = vpop.f32.mrf.mxu2 }
 0x21c   : > { %v771_v59 = vmax.f32 %v708_v51, 0.0 }
 0x21e   : > { %803 = vst.msk [vmem:[%s3272_s4 + $0x58] sm:$0xff] %vm428_vm0, %v771_v59  ;;  %v2701_v1 = vpack.c.bf16 %v771_v59, %v770_v47 }
 0x221   : > { %v621_v5 = vpop.f32.mrf.mxu1 }
 0x222   : > { %v711_v10 = vadd.f32 %v710_v53, %v621_v5 }
 0x223   : > { %v712_v16 = vpop.f32.mrf.mxu2 }
 0x224   : > { %v772_v17 = vmax.f32 %v711_v10, 0.0  ;;  %660 = vmatmul.bf16.gmra.mxu1 %v2703_v4 }
 0x226   : > { %804 = vst.msk [vmem:[%s3272_s4 + $0x60] sm:$0xff] %vm428_vm0, %v772_v17 }
 0x228   : > { %754 = vmatmul.bf16.gmra.mxu2 %v2706_v19 }
 0x229   : > { %v623_v20 = vpop.f32.mrf.mxu1 }
 0x22a   : > { %v713_v22 = vadd.f32 %v712_v16, %v623_v20 }
 0x22b   : > { %v715_v23 = vpop.f32.mrf.mxu2 }
 0x22c   : > { %v773_v28 = vmax.f32 %v713_v22, 0.0 }
 0x22e   : > { %805 = vst.msk [vmem:[%s3272_s4 + $0x68] sm:$0xff] %vm428_vm0, %v773_v28  ;;  %v2717_v33 = vpack.c.bf16 %v773_v28, %v772_v17 }
 0x231   : > { %v626_v38 = vpop.f32.mrf.mxu1 }
 0x232   : > { %v716_v39 = vadd.f32 %v715_v23, %v626_v38 }
 0x233   : > { %v717_v40 = vpop.f32.mrf.mxu2 }
 0x234   : > { %v774_v41 = vmax.f32 %v716_v39, 0.0  ;;  %665 = vmatmul.bf16.gmra.mxu1 %v2719_v36 }
 0x236   : > { %806 = vst.msk [vmem:[%s3272_s4 + $0x70] sm:$0xff] %vm428_vm0, %v774_v41 }
 0x238   : > { %1939 = vmatmul.msk.bf16.vlgmr.msrb.gmra.mxu2 %vm428_vm0, %v2603_v54 }
 0x239   : > { %v628_v42 = vpop.f32.mrf.mxu1 }
 0x23a   : > { %v718_v46 = vadd.f32 %v717_v40, %v628_v42 }
 0x23b   : > { %v720_v47 = vpop.f32.mrf.mxu2 }
 0x23c   : > { %v775_v50 = vmax.f32 %v718_v46, 0.0 }
 0x23e   : > { %807 = vst.msk [vmem:[%s3272_s4 + $0x78] sm:$0xff] %vm428_vm0, %v775_v50  ;;  %v831_v51 = vpack.c.bf16 %v775_v50, %v774_v41 }
 0x240   : > { %1946 = vmatmul.msk.bf16.vlgmr.msra.gmra.mxu3 %vm428_vm0, %v831_v51 }
 0x241   : > { %v631_v53 = vpop.f32.mrf.mxu1 }
 0x242   : > { %v721_v59 = vadd.f32 %v720_v47, %v631_v53 }
 0x243   : > { %v722_v60 = vpop.f32.mrf.mxu2 }
 0x244   : > { %v776_v62 = vmax.f32 %v721_v59, 0.0 }
 0x246   : > { %808 = vst.msk [vmem:[%s3272_s4 + $0x80] sm:$0xff] %vm428_vm0, %v776_v62 }
 0x248   : > { %1940 = vmatmul.msk.bf16.gmra.mxu2 %vm428_vm0, %v2619_v13 }
 0x249   : > { %v633_v54 = vpop.f32.mrf.mxu1 }
 0x24a   : > { %v723_v5 = vadd.f32 %v722_v60, %v633_v54 }
 0x24b   : > { %v725_v7 = vpop.f32.mrf.mxu2 }
 0x24c   : > { %v777_v8 = vmax.f32 %v723_v5, 0.0 }
 0x24e   : > { %809 = vst.msk [vmem:[%s3272_s4 + $0x88] sm:$0xff] %vm428_vm0, %v777_v8  ;;  %v832_v10 = vpack.c.bf16 %v777_v8, %v776_v62 }
 0x250   : > { %1947 = vmatmul.msk.bf16.gmra.mxu3 %vm428_vm0, %v832_v10 }
 0x251   : > { %v636_v16 = vpop.f32.mrf.mxu1 }
 0x252   : > { %v726_v17 = vadd.f32 %v725_v7, %v636_v16 }
 0x253   : > { %v727_v20 = vpop.f32.mrf.mxu2 }
 0x254   : > { %v778_v22 = vmax.f32 %v726_v17, 0.0 }
 0x256   : > { %810 = vst.msk [vmem:[%s3272_s4 + $0x90] sm:$0xff] %vm428_vm0, %v778_v22 }
 0x258   : > { %1941 = vmatmul.msk.bf16.gmra.mxu2 %vm428_vm0, %v2635_v34 }
 0x259   : > { %v638_v13 = vpop.f32.mrf.mxu1 }
 0x25a   : > { %v728_v23 = vadd.f32 %v727_v20, %v638_v13 }
 0x25b   : > { %v730_v28 = vpop.f32.mrf.mxu2 }
 0x25c   : > { %v779_v29 = vmax.f32 %v728_v23, 0.0 }
 0x25e   : > { %811 = vst.msk [vmem:[%s3272_s4 + $0x98] sm:$0xff] %vm428_vm0, %v779_v29  ;;  %v833_v31 = vpack.c.bf16 %v779_v29, %v778_v22 }
 0x260   : > { %1948 = vmatmul.msk.bf16.gmra.mxu3 %vm428_vm0, %v833_v31 }
 0x261   : > { %v641_v38 = vpop.f32.mrf.mxu1 }
 0x262   : > { %v731_v39 = vadd.f32 %v730_v28, %v641_v38 }
 0x263   : > { %v732_v40 = vpop.f32.mrf.mxu2 }
 0x264   : > { %v780_v41 = vmax.f32 %v731_v39, 0.0 }
 0x266   : > { %812 = vst.msk [vmem:[%s3272_s4 + $0xa0] sm:$0xff] %vm428_vm0, %v780_v41 }
 0x268   : > { %1942 = vmatmul.msk.bf16.gmra.mxu2 %vm428_vm0, %v2651_v57 }
 0x269   : > { %v643_v34 = vpop.f32.mrf.mxu1 }
 0x26a   : > { %v733_v42 = vadd.f32 %v732_v40, %v643_v34 }
 0x26b   : > { %v735_v46 = vpop.f32.mrf.mxu2 }
 0x26c   : > { %v781_v47 = vmax.f32 %v733_v42, 0.0 }
 0x26e   : > { %813 = vst.msk [vmem:[%s3272_s4 + $0xa8] sm:$0xff] %vm428_vm0, %v781_v47  ;;  %v834_v50 = vpack.c.bf16 %v781_v47, %v780_v41 }
 0x270   : > { %1949 = vmatmul.msk.bf16.gmra.mxu3 %vm428_vm0, %v834_v50 }
 0x271   : > { %v646_v51 = vpop.f32.mrf.mxu1 }
 0x272   : > { %v736_v53 = vadd.f32 %v735_v46, %v646_v51 }
 0x273   : > { %v737_v59 = vpop.f32.mrf.mxu2 }
 0x274   : > { %v782_v60 = vmax.f32 %v736_v53, 0.0 }
 0x276   : > { %814 = vst.msk [vmem:[%s3272_s4 + $0xb0] sm:$0xff] %vm428_vm0, %v782_v60 }
 0x278   : > { %1943 = vmatmul.msk.bf16.gmra.mxu2 %vm428_vm0, %v2673_v26 }
 0x279   : > { %v648_v57 = vpop.f32.mrf.mxu1 }
 0x27a   : > { %v738_v62 = vadd.f32 %v737_v59, %v648_v57 }
 0x27b   : > { %v740_v54 = vpop.f32.mrf.mxu2 }
 0x27c   : > { %v783_v5 = vmax.f32 %v738_v62, 0.0 }
 0x27e   : > { %815 = vst.msk [vmem:[%s3272_s4 + $0xb8] sm:$0xff] %vm428_vm0, %v783_v5  ;;  %v835_v7 = vpack.c.bf16 %v783_v5, %v782_v60 }
 0x280   : > { %1950 = vmatmul.msk.bf16.gmra.mxu3 %vm428_vm0, %v835_v7 }
 0x281   : > { %v651_v8 = vpop.f32.mrf.mxu1 }
 0x282   : > { %v741_v10 = vadd.f32 %v740_v54, %v651_v8 }
 0x283   : > { %v742_v16 = vpop.f32.mrf.mxu2 }
 0x284   : > { %v784_v17 = vmax.f32 %v741_v10, 0.0 }
 0x286   : > { %816 = vst.msk [vmem:[%s3272_s4 + $0xc0] sm:$0xff] %vm428_vm0, %v784_v17 }
 0x288   : > { %1944 = vmatmul.msk.bf16.gmra.mxu2 %vm428_vm0, %v2701_v1 }
 0x289   : > { %v653_v26 = vpop.f32.mrf.mxu1 }
 0x28a   : > { %v743_v20 = vadd.f32 %v742_v16, %v653_v26 }
 0x28b   : > { %v745_v22 = vpop.f32.mrf.mxu2 }
 0x28c   : > { %v785_v13 = vmax.f32 %v743_v20, 0.0 }
 0x28e   : > { %817 = vst.msk [vmem:[%s3272_s4 + $0xc8] sm:$0xff] %vm428_vm0, %v785_v13  ;;  %v836_v23 = vpack.c.bf16 %v785_v13, %v784_v17 }
 0x290   : > { %1951 = vmatmul.msk.bf16.gmra.mxu3 %vm428_vm0, %v836_v23 }
 0x291   : > { %v656_v28 = vpop.f32.mrf.mxu1 }
 0x292   : > { %v746_v29 = vadd.f32 %v745_v22, %v656_v28 }
 0x293   : > { %v747_v31 = vpop.f32.mrf.mxu2 }
 0x294   : > { %v786_v38 = vmax.f32 %v746_v29, 0.0 }
 0x296   : > { %818 = vst.msk [vmem:[%s3272_s4 + $0xd0] sm:$0xff] %vm428_vm0, %v786_v38 }
 0x298   : > { %1945 = vmatmul.msk.bf16.gmra.mxu2 %vm428_vm0, %v2717_v33 }
 0x299   : > { %v658_v1 = vpop.f32.mrf.mxu1 }
 0x29a   : > { %v748_v39 = vadd.f32 %v747_v31, %v658_v1 }
 0x29b   : > { %v750_v40 = vpop.f32.mrf.mxu2 }
 0x29c   : > { %v787_v41 = vmax.f32 %v748_v39, 0.0 }
 0x29e   : > { %819 = vst.msk [vmem:[%s3272_s4 + $0xd8] sm:$0xff] %vm428_vm0, %v787_v41  ;;  %v837_v34 = vpack.c.bf16 %v787_v41, %v786_v38 }
 0x2a0   : > { %1952 = vmatmul.msk.bf16.gmra.mxu3 %vm428_vm0, %v837_v34 }
 0x2a1   : > { %v661_v42 = vpop.f32.mrf.mxu1 }
 0x2a2   : > { %v751_v46 = vadd.f32 %v750_v40, %v661_v42 }
 0x2a3   : > { %v752_v47 = vpop.f32.mrf.mxu2 }
 0x2a4   : > { %v788_v50 = vmax.f32 %v751_v46, 0.0 }
 0x2a6   : > { %820 = vst.msk [vmem:[%s3272_s4 + $0xe0] sm:$0xff] %vm428_vm0, %v788_v50 }
 0x2a9   : > { %v663_v33 = vpop.f32.mrf.mxu1 }
 0x2aa   : > { %v753_v51 = vadd.f32 %v752_v47, %v663_v33 }
 0x2ab   : > { %v755_v53 = vpop.f32.mrf.mxu2 }
 0x2ac   : > { %v789_v59 = vmax.f32 %v753_v51, 0.0 }
 0x2ae   : > { %821 = vst.msk [vmem:[%s3272_s4 + $0xe8] sm:$0xff] %vm428_vm0, %v789_v59  ;;  %v838_v60 = vpack.c.bf16 %v789_v59, %v788_v50 }
 0x2b0   : > { %1953 = vmatmul.msk.bf16.gmra.mxu3 %vm428_vm0, %v838_v60 }
 0x2b1   : > { %v666_v57 = vpop.f32.mrf.mxu1 }
 0x2b2   : > { %v756_v62 = vadd.f32 %v755_v53, %v666_v57 }
 0x2b3   : > { %v757_v54 = vpop.f32.mrf.mxu2 }
 0x2b4   : > { %v790_v5 = vmax.f32 %v756_v62, 0.0 }
 0x2b6   : > { %822 = vst.msk [vmem:[%s3272_s4 + $0xf0] sm:$0xff] %vm428_vm0, %v790_v5 }
 0x2b9   : > { %v668_v7 = vpop.f32.mrf.mxu1 }
 0x2ba   : > { %v758_v8 = vadd.f32 %v757_v54, %v668_v7 }
 0x2bb   : > { %v909_v10 = vpop.f32.mrf.mxu2 }
 0x2bc   : > { %v791_v16 = vmax.f32 %v758_v8, 0.0 }
 0x2be   : > { %823 = vst.msk [vmem:[%s3272_s4 + $0xf8] sm:$0xff] %vm428_vm0, %v791_v16  ;;  %v839_v17 = vpack.c.bf16 %v791_v16, %v790_v5 }
 0x2c0   : > { %1954 = vmatmul.msk.bf16.gmra.mxu3 %vm428_vm0, %v839_v17 }
 0x2c3   : > { %v911_v26 = vpop.f32.mrf.mxu2  ;;  %v944_v20 = vpop.f32.mrf.mxu3 }
 0x2c4   : > { %v989_v22 = vpack.c.bf16 %v911_v26, %v909_v10 }
 0x2cb   : > { %v914_v13 = vpop.f32.mrf.mxu2  ;;  %v946_v23 = vpop.f32.mrf.mxu3 }
 0x2cc   : > { %v996_v28 = vpack.c.bf16 %v946_v23, %v944_v20 }
 0x2ce   : > { %1005 = vmatpush.bf16.msrb.mxu0 %v996_v28 }
 0x2d3   : > { %v916_v29 = vpop.f32.mrf.mxu2  ;;  %v949_v31 = vpop.f32.mrf.mxu3 }
 0x2d4   : > { %v990_v38 = vpack.c.bf16 %v916_v29, %v914_v13 }
 0x2db   : > { %v919_v1 = vpop.f32.mrf.mxu2  ;;  %v951_v39 = vpop.f32.mrf.mxu3 }
 0x2e3   : > { %v921_v40 = vpop.f32.mrf.mxu2  ;;  %v954_v41 = vpop.f32.mrf.mxu3 }
 0x2e4   : > { %v991_v34 = vpack.c.bf16 %v921_v40, %v919_v1 }
 0x2eb   : > { %v924_v42 = vpop.f32.mrf.mxu2  ;;  %v956_v46 = vpop.f32.mrf.mxu3 }
 0x2f3   : > { %v926_v47 = vpop.f32.mrf.mxu2  ;;  %v959_v50 = vpop.f32.mrf.mxu3 }
 0x2f4   : > { %v992_v13 = vpack.c.bf16 %v926_v47, %v924_v42 }
 0x2fb   : > { %v929_v33 = vpop.f32.mrf.mxu2  ;;  %v961_v51 = vpop.f32.mrf.mxu3 }
 0x303   : > { %v931_v53 = vpop.f32.mrf.mxu2  ;;  %v964_v59 = vpop.f32.mrf.mxu3 }
 0x304   : > { %v993_v20 = vpack.c.bf16 %v931_v53, %v929_v33 }
 0x30b   : > { %v934_v60 = vpop.f32.mrf.mxu2  ;;  %v966_v57 = vpop.f32.mrf.mxu3 }
 0x30c   : > { %v1000_v42 = vpack.c.bf16 %v966_v57, %v964_v59 }
 0x313   : > { %v936_v62 = vpop.f32.mrf.mxu2  ;;  %v969_v54 = vpop.f32.mrf.mxu3 }
 0x314   : > { %v994_v17 = vpack.c.bf16 %v936_v62, %v934_v60 }
 0x31b   : > { %v939_v5 = vpop.f32.mrf.mxu2  ;;  %v971_v7 = vpop.f32.mrf.mxu3 }
 0x31c   : > { %v1001_v33 = vpack.c.bf16 %v971_v7, %v969_v54 }
 0x323   : > { %v941_v8 = vpop.f32.mrf.mxu2  ;;  %v974_v10 = vpop.f32.mrf.mxu3 }
 0x324   : > { %v995_v16 = vpack.c.bf16 %v941_v8, %v939_v5 }
 0x326   : > { %1006 = vmatpush.bf16.msrb.mxu0 %v995_v16 }
 0x32a   : > { %1007 = vmatpush.bf16.msrb.mxu0 %v994_v17 }
 0x32b   : > { %v976_v26 = vpop.f32.mrf.mxu3 }
 0x32c   : > { %v1002_v60 = vpack.c.bf16 %v976_v26, %v974_v10 }
 0x32e   : > { %1008 = vmatpush.bf16.msrb.mxu0 %v993_v20 }
 0x332   : > { %1009 = vmatpush.bf16.msrb.mxu0 %v992_v13 }
 0x333   : > { %v979_v23 = vpop.f32.mrf.mxu3 }
 0x336   : > { %1010 = vmatpush.bf16.msrb.mxu0 %v991_v34  ;;  %v999_v34 = vpack.c.bf16 %v961_v51, %v959_v50 }
 0x33a   : > { %1011 = vmatpush.bf16.msrb.mxu0 %v990_v38 }
 0x33b   : > { %v981_v28 = vpop.f32.mrf.mxu3 }
 0x33c   : > { %v1003_v5 = vpack.c.bf16 %v981_v28, %v979_v23 }
 0x33e   : > { %1012 = vmatpush.bf16.msrb.mxu0 %v989_v22  ;;  %v998_v22 = vpack.c.bf16 %v956_v46, %v954_v41 }
 0x341   : > { %1013 = vmatmul.bf16.vlgmr.msrb.gmra.mxu0 %v2535_v49  ;;  %v997_v49 = vpack.c.bf16 %v951_v39, %v949_v31 }
 0x343   : > { %v984_v29 = vpop.f32.mrf.mxu3 }
 0x34b   : > { %v986_v1 = vpop.f32.mrf.mxu3 }
 0x34c   : > { %v1004_v40 = vpack.c.bf16 %v986_v1, %v984_v29 }
 0x34e   : > { %1094 = vmatpush.bf16.msrb.mxu3 %v1004_v40 }
 0x351   : > { %1018 = vmatmul.bf16.gmra.mxu0 %v2541_v55 }
 0x352   : > { %1095 = vmatpush.bf16.msrb.mxu3 %v1003_v5 }
 0x356   : > { %1096 = vmatpush.bf16.msrb.mxu3 %v1002_v60 }
 0x35a   : > { %1097 = vmatpush.bf16.msrb.mxu3 %v1001_v33 }
 0x35e   : > { %1098 = vmatpush.bf16.msrb.mxu3 %v1000_v42 }
 0x361   : > { %1023 = vmatmul.bf16.gmra.mxu0 %v2547_v61 }
 0x362   : > { %1099 = vmatpush.bf16.msrb.mxu3 %v999_v34 }
 0x366   : > { %1100 = vmatpush.bf16.msrb.mxu3 %v998_v22 }
 0x36a   : > { %1101 = vmatpush.bf16.msrb.mxu3 %v997_v49 }
 0x36d   : > { %1102 = vmatmul.bf16.vlgmr.msrb.gmra.mxu3 %v2530_v43 }
 0x371   : > { %1028 = vmatmul.bf16.gmra.mxu0 %v2553_v3 }
 0x37d   : > { %1107 = vmatmul.bf16.gmra.mxu3 %v2538_v52 }
 0x381   : > { %1033 = vmatmul.bf16.gmra.mxu0 %v2559_v9 }
 0x38d   : > { %1112 = vmatmul.bf16.gmra.mxu3 %v2544_v58 }
 0x391   : > { %1038 = vmatmul.bf16.gmra.mxu0 %v2565_v15 }
 0x39d   : > { %1117 = vmatmul.bf16.gmra.mxu3 %v2550_v0 }
 0x3a1   : > { %1043 = vmatmul.bf16.gmra.mxu0 %v2571_v21 }
 0x3ad   : > { %1122 = vmatmul.bf16.gmra.mxu3 %v2556_v6 }
 0x3b1   : > { %1048 = vmatmul.bf16.gmra.mxu0 %v2577_v27 }
 0x3bd   : > { %1127 = vmatmul.bf16.gmra.mxu3 %v2562_v12 }
 0x3be   : > { %v1014_v43 = vpop.f32.mrf.mxu0 }
 0x3c1   : > { %1053 = vmatmul.bf16.gmra.mxu0 %v2589_v37 }
 0x3c6   : > { %v1016_v52 = vpop.f32.mrf.mxu0 }
 0x3cd   : > { %1132 = vmatmul.bf16.gmra.mxu3 %v2568_v18 }
 0x3ce   : > { %v1019_v55 = vpop.f32.mrf.mxu0 }
 0x3d1   : > { %1058 = vmatmul.bf16.gmra.mxu0 %v2605_v56 }
 0x3d6   : > { %v1021_v58 = vpop.f32.mrf.mxu0 }
 0x3dd   : > { %1137 = vmatmul.bf16.gmra.mxu3 %v2574_v24 }
 0x3de   : > { %v1024_v61 = vpop.f32.mrf.mxu0 }
 0x3e1   : > { %1063 = vmatmul.bf16.gmra.mxu0 %v2621_v14 }
 0x3e6   : > { %v1026_v3 = vpop.f32.mrf.mxu0 }
 0x3ed   : > { %1142 = vmatmul.bf16.gmra.mxu3 %v2580_v30 }
 0x3ee   : > { %v1029_v15 = vpop.f32.mrf.mxu0 }
 0x3f0   : > { %v1103_v0 = vpop.f32.mrf.mxu3 }
 0x3f1   : > { %v1104_v6 = vadd.f32 %v1103_v0, %v1014_v43  ;;  %1068 = vmatmul.bf16.gmra.mxu0 %v2637_v35 }
 0x3f3   : > { %1184 = vst.msk [vmem:[%s3273_s5] sm:$0xff] %vm1183_vm1, %v1104_v6  ;;  %v1376_v9 = vpack.c.bf16 %v1104_v6, %v1104_v6  ;;  %1248 = vrot.lane.b32.xlu0 %v1104_v6, %s2281_s15 }
 0x3f5   : > { %1409 = vst.msk [vmem:[#allocation2] sm:$0xf] %vm1408_vm2, %v1376_v9 }
 0x3f6   : > { %v1031_v27 = vpop.f32.mrf.mxu0 }
 0x3f8   : > { %v1105_v12 = vpop.f32.mrf.mxu3 }
 0x3f9   : > { %v1106_v18 = vadd.f32 %v1105_v12, %v1016_v52 }
 0x3fb   : > { %1185 = vst.msk [vmem:[%s3273_s5 + $0x8] sm:$0xff] %vm1183_vm1, %v1106_v18  ;;  %v1377_v21 = vpack.c.bf16 %v1106_v18, %v1106_v18  ;;  %1250 = vrot.lane.b32.xlu0 %v1106_v18, %s2281_s15 }
 0x3fd   : > { %1410 = vst.msk [vmem:[#allocation2 + $0x4] sm:$0xf] %vm1408_vm2, %v1377_v21  ;;  %1147 = vmatmul.bf16.gmra.mxu3 %v2592_v45 }
 0x3fe   : > { %v1034_v14 = vpop.f32.mrf.mxu0 }
 0x400   : > { %v1108_v24 = vpop.f32.mrf.mxu3 }
 0x401   : > { %v1109_v30 = vadd.f32 %v1108_v24, %v1019_v55  ;;  %1073 = vmatmul.bf16.gmra.mxu0 %v2659_v63 }
 0x403   : > { %1186 = vst.msk [vmem:[%s3273_s5 + $0x10] sm:$0xff] %vm1183_vm1, %v1109_v30  ;;  %v1378_v37 = vpack.c.bf16 %v1109_v30, %v1109_v30  ;;  %1252 = vrot.lane.b32.xlu1 %v1109_v30, %s2281_s15 }
 0x405   : > { %1411 = vst.msk [vmem:[#allocation2 + $0x8] sm:$0xf] %vm1408_vm2, %v1378_v37 }
 0x406   : > { %v1036_v31 = vpop.f32.mrf.mxu0 }
 0x408   : > { %v1110_v56 = vpop.f32.mrf.mxu3 }
 0x409   : > { %v1111_v35 = vadd.f32 %v1110_v56, %v1021_v58 }
 0x40b   : > { %1187 = vst.msk [vmem:[%s3273_s5 + $0x18] sm:$0xff] %vm1183_vm1, %v1111_v35  ;;  %v1379_v45 = vpack.c.bf16 %v1111_v35, %v1111_v35  ;;  %1254 = vrot.lane.b32.xlu1 %v1111_v35, %s2281_s15 }
 0x40d   : > { %1412 = vst.msk [vmem:[#allocation2 + $0xc] sm:$0xf] %vm1408_vm2, %v1379_v45  ;;  %1152 = vmatmul.bf16.gmra.mxu3 %v2608_v2 }
 0x40e   : > { %v1039_v46 = vpop.f32.mrf.mxu0 }
 0x410   : > { %v1113_v63 = vpop.f32.mrf.mxu3 }
 0x411   : > { %v1114_v38 = vadd.f32 %v1113_v63, %v1024_v61  ;;  %1078 = vmatmul.bf16.gmra.mxu0 %v2681_v32 }
 0x413   : > { %1188 = vst.msk [vmem:[%s3273_s5 + $0x20] sm:$0xff] %vm1183_vm1, %v1114_v38  ;;  %v1380_v39 = vpack.c.bf16 %v1114_v38, %v1114_v38  ;;  %1256 = vrot.lane.b32.xlu2 %v1114_v38, %s2281_s15 }
 0x415   : > { %1413 = vst.msk [vmem:[#allocation2 + $0x10] sm:$0xf] %vm1408_vm2, %v1380_v39 }
 0x416   : > { %v1041_v50 = vpop.f32.mrf.mxu0 }
 0x418   : > { %v1115_v41 = vpop.f32.mrf.mxu3 }
 0x419   : > { %v1116_v47 = vadd.f32 %v1115_v41, %v1026_v3 }
 0x41b   : > { %1189 = vst.msk [vmem:[%s3273_s5 + $0x28] sm:$0xff] %vm1183_vm1, %v1116_v47  ;;  %v1381_v2 = vpack.c.bf16 %v1116_v47, %v1116_v47  ;;  %1258 = vrot.lane.b32.xlu2 %v1116_v47, %s2281_s15 }
 0x41d   : > { %1414 = vst.msk [vmem:[#allocation2 + $0x14] sm:$0xf] %vm1408_vm2, %v1381_v2  ;;  %1157 = vmatmul.bf16.gmra.mxu3 %v2624_v25 }
 0x41e   : > { %v1044_v62 = vpop.f32.mrf.mxu0 }
 0x420   : > { %v1118_v32 = vpop.f32.mrf.mxu3 }
 0x421   : > { %v1119_v51 = vadd.f32 %v1118_v32, %v1029_v15  ;;  %1083 = vmatmul.bf16.gmra.mxu0 %v2703_v4 }
 0x423   : > { %1190 = vst.msk [vmem:[%s3273_s5 + $0x30] sm:$0xff] %vm1183_vm1, %v1119_v51  ;;  %v1382_v53 = vpack.c.bf16 %v1119_v51, %v1119_v51  ;;  %1260 = vrot.lane.b32.xlu0 %v1119_v51, %s2281_s15 }
 0x425   : > { %1415 = vst.msk [vmem:[#allocation2 + $0x18] sm:$0xf] %vm1408_vm2, %v1382_v53 }
 0x426   : > { %v1046_v8 = vpop.f32.mrf.mxu0 }
 0x428   : > { %v1120_v59 = vpop.f32.mrf.mxu3 }
 0x429   : > { %v1121_v57 = vadd.f32 %v1120_v59, %v1031_v27 }
 0x42b   : > { %1191 = vst.msk [vmem:[%s3273_s5 + $0x38] sm:$0xff] %vm1183_vm1, %v1121_v57  ;;  %v1383_v25 = vpack.c.bf16 %v1121_v57, %v1121_v57  ;;  %1262 = vrot.lane.b32.xlu1 %v1121_v57, %s2281_s15 }
 0x42d   : > { %1416 = vst.msk [vmem:[#allocation2 + $0x1c] sm:$0xf] %vm1408_vm2, %v1383_v25  ;;  %1162 = vmatmul.bf16.gmra.mxu3 %v2640_v44 }
 0x430   : > { %v1123_v4 = vpop.f32.mrf.mxu3 }
 0x431   : > { %v1124_v54 = vadd.f32 %v1123_v4, %v1034_v14  ;;  %1088 = vmatmul.bf16.gmra.mxu0 %v2719_v36  ;;  %v1049_v36 = vpop.f32.mrf.mxu0 }
 0x433   : > { %1192 = vst.msk [vmem:[%s3273_s5 + $0x40] sm:$0xff] %vm1183_vm1, %v1124_v54  ;;  %v1384_v7 = vpack.c.bf16 %v1124_v54, %v1124_v54  ;;  %1264 = vrot.lane.b32.xlu2 %v1124_v54, %s2281_s15 }
 0x435   : > { %1417 = vst.msk [vmem:[#allocation2 + $0x20] sm:$0xf] %vm1408_vm2, %v1384_v7 }
 0x438   : > { %v1125_v10 = vpop.f32.mrf.mxu3 }
 0x439   : > { %v1126_v16 = vadd.f32 %v1125_v10, %v1036_v31  ;;  %v1051_v23 = vpop.f32.mrf.mxu0 }
 0x43b   : > { %1193 = vst.msk [vmem:[%s3273_s5 + $0x48] sm:$0xff] %vm1183_vm1, %v1126_v16  ;;  %v1385_v44 = vpack.c.bf16 %v1126_v16, %v1126_v16  ;;  %1266 = vrot.lane.b32.xlu0 %v1126_v16, %s2281_s15 }
 0x43d   : > { %1418 = vst.msk [vmem:[#allocation2 + $0x24] sm:$0xf] %vm1408_vm2, %v1385_v44  ;;  %1167 = vmatmul.bf16.gmra.mxu3 %v2662_v11 }
 0x440   : > { %v1128_v17 = vpop.f32.mrf.mxu3 }
 0x441   : > { %v1129_v26 = vadd.f32 %v1128_v17, %v1039_v46  ;;  %v1054_v40 = vpop.f32.mrf.mxu0 }
 0x443   : > { %1194 = vst.msk [vmem:[%s3273_s5 + $0x50] sm:$0xff] %vm1183_vm1, %v1129_v26  ;;  %v1386_v20 = vpack.c.bf16 %v1129_v26, %v1129_v26  ;;  %1268 = vrot.lane.b32.xlu1 %v1129_v26, %s2281_s15 }
 0x445   : > { %1419 = vst.msk [vmem:[#allocation2 + $0x28] sm:$0xf] %vm1408_vm2, %v1386_v20 }
 0x448   : > { %v1130_v13 = vpop.f32.mrf.mxu3 }
 0x449   : > { %v1131_v28 = vadd.f32 %v1130_v13, %v1041_v50  ;;  %v1056_v42 = vpop.f32.mrf.mxu0 }
 0x44b   : > { %1195 = vst.msk [vmem:[%s3273_s5 + $0x58] sm:$0xff] %vm1183_vm1, %v1131_v28  ;;  %v1387_v11 = vpack.c.bf16 %v1131_v28, %v1131_v28  ;;  %1270 = vrot.lane.b32.xlu2 %v1131_v28, %s2281_s15 }
 0x44d   : > { %1420 = vst.msk [vmem:[#allocation2 + $0x2c] sm:$0xf] %vm1408_vm2, %v1387_v11  ;;  %1172 = vmatmul.bf16.gmra.mxu3 %v2690_v48 }
 0x450   : > { %v1133_v29 = vpop.f32.mrf.mxu3 }
 0x451   : > { %v1134_v1 = vadd.f32 %v1133_v29, %v1044_v62  ;;  %v1059_v52 = vpop.f32.mrf.mxu0 }
 0x453   : > { %1196 = vst.msk [vmem:[%s3273_s5 + $0x60] sm:$0xff] %vm1183_vm1, %v1134_v1  ;;  %v1388_v5 = vpack.c.bf16 %v1134_v1, %v1134_v1  ;;  %1272 = vrot.lane.b32.xlu0 %v1134_v1, %s2281_s15 }
 0x455   : > { %1421 = vst.msk [vmem:[#allocation2 + $0x30] sm:$0xf] %vm1408_vm2, %v1388_v5 }
 0x458   : > { %v1135_v60 = vpop.f32.mrf.mxu3 }
 0x459   : > { %v1136_v33 = vadd.f32 %v1135_v60, %v1046_v8  ;;  %v1061_v6 = vpop.f32.mrf.mxu0 }
 0x45b   : > { %1197 = vst.msk [vmem:[%s3273_s5 + $0x68] sm:$0xff] %vm1183_vm1, %v1136_v33  ;;  %v1389_v48 = vpack.c.bf16 %v1136_v33, %v1136_v33  ;;  %1274 = vrot.lane.b32.xlu1 %v1136_v33, %s2281_s15 }
 0x45d   : > { %1422 = vst.msk [vmem:[#allocation2 + $0x34] sm:$0xf] %vm1408_vm2, %v1389_v48  ;;  %1177 = vmatmul.bf16.gmra.mxu3 %v2706_v19 }
 0x460   : > { %v1138_v34 = vpop.f32.mrf.mxu3 }
 0x461   : > { %v1139_v22 = vadd.f32 %v1138_v34, %v1049_v36  ;;  %v1064_v27 = vpop.f32.mrf.mxu0 }
 0x463   : > { %1198 = vst.msk [vmem:[%s3273_s5 + $0x70] sm:$0xff] %vm1183_vm1, %v1139_v22  ;;  %v1390_v49 = vpack.c.bf16 %v1139_v22, %v1139_v22  ;;  %1276 = vrot.lane.b32.xlu2 %v1139_v22, %s2281_s15 }
 0x465   : > { %1423 = vst.msk [vmem:[#allocation2 + $0x38] sm:$0xf] %vm1408_vm2, %v1390_v49  ;;  %v1249_v43 = vpop.permute.xlu0 %1248 }
 0x466   : > { %1344 = vst.msk [vmem:[%s3274_s6] sm:$0xff] %vm1183_vm1, %v1249_v43 }
 0x468   : > { %v1140_v19 = vpop.f32.mrf.mxu3 }
 0x469   : > { %v1141_v55 = vadd.f32 %v1140_v19, %v1051_v23  ;;  %v1066_v45 = vpop.f32.mrf.mxu0 }
 0x46b   : > { %1199 = vst.msk [vmem:[%s3273_s5 + $0x78] sm:$0xff] %vm1183_vm1, %v1141_v55  ;;  %v1391_v58 = vpack.c.bf16 %v1141_v55, %v1141_v55  ;;  %1278 = vrot.lane.b32.xlu0 %v1141_v55, %s2281_s15 }
 0x46d   : > { %1424 = vst.msk [vmem:[#allocation2 + $0x3c] sm:$0xf] %vm1408_vm2, %v1391_v58  ;;  %v1257_v61 = vpop.permute.xlu2 %1256  ;;  %v1251_v0 = vpop.permute.xlu0 %1250 }
 0x46e   : > { %1348 = vst.msk [vmem:[%s3274_s6 + $0x20] sm:$0xff] %vm1183_vm1, %v1257_v61 }
 0x46f   : > { %1345 = vst.msk [vmem:[%s3274_s6 + $0x8] sm:$0xff] %vm1183_vm1, %v1251_v0 }
 0x470   : > { %v1143_v3 = vpop.f32.mrf.mxu3 }
 0x471   : > { %v1144_v9 = vadd.f32 %v1143_v3, %v1054_v40  ;;  %v1069_v41 = vpop.f32.mrf.mxu0 }
 0x473   : > { %1200 = vst.msk [vmem:[%s3273_s5 + $0x80] sm:$0xff] %vm1183_vm1, %v1144_v9  ;;  %v1392_v12 = vpack.c.bf16 %v1144_v9, %v1144_v9  ;;  %1280 = vrot.lane.b32.xlu1 %v1144_v9, %s2281_s15 }
 0x475   : > { %1425 = vst.msk [vmem:[#allocation2 + $0x40] sm:$0xf] %vm1408_vm2, %v1392_v12  ;;  %v1259_v15 = vpop.permute.xlu2 %1258  ;;  %v1253_v18 = vpop.permute.xlu1 %1252 }
 0x476   : > { %1349 = vst.msk [vmem:[%s3274_s6 + $0x28] sm:$0xff] %vm1183_vm1, %v1259_v15 }
 0x477   : > { %1346 = vst.msk [vmem:[%s3274_s6 + $0x10] sm:$0xff] %vm1183_vm1, %v1253_v18 }
 0x478   : > { %v1145_v21 = vpop.f32.mrf.mxu3 }
 0x479   : > { %v1146_v24 = vadd.f32 %v1145_v21, %v1056_v42  ;;  %v1071_v51 = vpop.f32.mrf.mxu0 }
 0x47b   : > { %1201 = vst.msk [vmem:[%s3273_s5 + $0x88] sm:$0xff] %vm1183_vm1, %v1146_v24  ;;  %v1393_v30 = vpack.c.bf16 %v1146_v24, %v1146_v24  ;;  %1282 = vrot.lane.b32.xlu2 %v1146_v24, %s2281_s15 }
 0x47d   : > { %1426 = vst.msk [vmem:[#allocation2 + $0x44] sm:$0xf] %vm1408_vm2, %v1393_v30  ;;  %v1255_v37 = vpop.permute.xlu1 %1254 }
 0x47e   : > { %1347 = vst.msk [vmem:[%s3274_s6 + $0x18] sm:$0xff] %vm1183_vm1, %v1255_v37 }
 0x480   : > { %v1148_v56 = vpop.f32.mrf.mxu3 }
 0x481   : > { %v1149_v14 = vadd.f32 %v1148_v56, %v1059_v52  ;;  %v1074_v4 = vpop.f32.mrf.mxu0 }
 0x483   : > { %1202 = vst.msk [vmem:[%s3273_s5 + $0x90] sm:$0xff] %vm1183_vm1, %v1149_v14  ;;  %v1394_v35 = vpack.c.bf16 %v1149_v14, %v1149_v14  ;;  %1284 = vrot.lane.b32.xlu0 %v1149_v14, %s2281_s15 }
 0x485   : > { %1427 = vst.msk [vmem:[#allocation2 + $0x48] sm:$0xf] %vm1408_vm2, %v1394_v35 }
 0x488   : > { %v1150_v63 = vpop.f32.mrf.mxu3 }
 0x489   : > { %v1151_v31 = vadd.f32 %v1150_v63, %v1061_v6  ;;  %v1076_v44 = vpop.f32.mrf.mxu0 }
 0x48b   : > { %1203 = vst.msk [vmem:[%s3273_s5 + $0x98] sm:$0xff] %vm1183_vm1, %v1151_v31  ;;  %v1395_v38 = vpack.c.bf16 %v1151_v31, %v1151_v31  ;;  %1286 = vrot.lane.b32.xlu1 %v1151_v31, %s2281_s15 }
 0x48d   : > { %1428 = vst.msk [vmem:[#allocation2 + $0x4c] sm:$0xf] %vm1408_vm2, %v1395_v38  ;;  %v1265_v39 = vpop.permute.xlu2 %1264 }
 0x48e   : > { %1352 = vst.msk [vmem:[%s3274_s6 + $0x40] sm:$0xff] %vm1183_vm1, %v1265_v39 }
 0x490   : > { %v1153_v46 = vpop.f32.mrf.mxu3 }
 0x491   : > { %v1154_v47 = vadd.f32 %v1153_v46, %v1064_v27  ;;  %v1079_v23 = vpop.f32.mrf.mxu0 }
 0x493   : > { %1204 = vst.msk [vmem:[%s3273_s5 + $0xa0] sm:$0xff] %vm1183_vm1, %v1154_v47  ;;  %v1396_v2 = vpack.c.bf16 %v1154_v47, %v1154_v47  ;;  %1288 = vrot.lane.b32.xlu2 %v1154_v47, %s2281_s15 }
 0x495   : > { %1429 = vst.msk [vmem:[#allocation2 + $0x50] sm:$0xf] %vm1408_vm2, %v1396_v2  ;;  %v1261_v32 = vpop.permute.xlu0 %1260 }
 0x496   : > { %1350 = vst.msk [vmem:[%s3274_s6 + $0x30] sm:$0xff] %vm1183_vm1, %v1261_v32 }
 0x498   : > { %v1155_v50 = vpop.f32.mrf.mxu3 }
 0x499   : > { %v1156_v53 = vadd.f32 %v1155_v50, %v1066_v45  ;;  %v1081_v5 = vpop.f32.mrf.mxu0 }
 0x49b   : > { %1205 = vst.msk [vmem:[%s3273_s5 + $0xa8] sm:$0xff] %vm1183_vm1, %v1156_v53  ;;  %v1397_v59 = vpack.c.bf16 %v1156_v53, %v1156_v53  ;;  %1290 = vrot.lane.b32.xlu0 %v1156_v53, %s2281_s15 }
 0x49d   : > { %1430 = vst.msk [vmem:[#allocation2 + $0x54] sm:$0xf] %vm1408_vm2, %v1397_v59  ;;  %v1263_v57 = vpop.permute.xlu1 %1262 }
 0x49e   : > { %1351 = vst.msk [vmem:[%s3274_s6 + $0x38] sm:$0xff] %vm1183_vm1, %v1263_v57 }
 0x4a0   : > { %v1158_v62 = vpop.f32.mrf.mxu3 }
 0x4a1   : > { %v1159_v25 = vadd.f32 %v1158_v62, %v1069_v41  ;;  %v1084_v22 = vpop.f32.mrf.mxu0 }
 0x4a3   : > { %1206 = vst.msk [vmem:[%s3273_s5 + $0xb0] sm:$0xff] %vm1183_vm1, %v1159_v25  ;;  %v1398_v54 = vpack.c.bf16 %v1159_v25, %v1159_v25  ;;  %1292 = vrot.lane.b32.xlu1 %v1159_v25, %s2281_s15 }
 0x4a5   : > { %1431 = vst.msk [vmem:[#allocation2 + $0x58] sm:$0xf] %vm1408_vm2, %v1398_v54  ;;  %v1271_v7 = vpop.permute.xlu2 %1270 }
 0x4a6   : > { %1355 = vst.msk [vmem:[%s3274_s6 + $0x58] sm:$0xff] %vm1183_vm1, %v1271_v7 }
 0x4a8   : > { %v1160_v8 = vpop.f32.mrf.mxu3 }
 0x4a9   : > { %v1161_v10 = vadd.f32 %v1160_v8, %v1071_v51  ;;  %v1086_v58 = vpop.f32.mrf.mxu0 }
 0x4ab   : > { %1207 = vst.msk [vmem:[%s3273_s5 + $0xb8] sm:$0xff] %vm1183_vm1, %v1161_v10  ;;  %v1399_v16 = vpack.c.bf16 %v1161_v10, %v1161_v10  ;;  %1294 = vrot.lane.b32.xlu2 %v1161_v10, %s2281_s15 }
 0x4ad   : > { %1432 = vst.msk [vmem:[#allocation2 + $0x5c] sm:$0xf] %vm1408_vm2, %v1399_v16  ;;  %v1267_v36 = vpop.permute.xlu0 %1266 }
 0x4ae   : > { %1353 = vst.msk [vmem:[%s3274_s6 + $0x48] sm:$0xff] %vm1183_vm1, %v1267_v36 }
 0x4b0   : > { %v1163_v17 = vpop.f32.mrf.mxu3 }
 0x4b1   : > { %v1164_v26 = vadd.f32 %v1163_v17, %v1074_v4  ;;  %v1089_v12 = vpop.f32.mrf.mxu0 }
 0x4b3   : > { %1208 = vst.msk [vmem:[%s3273_s5 + $0xc0] sm:$0xff] %vm1183_vm1, %v1164_v26  ;;  %v1400_v20 = vpack.c.bf16 %v1164_v26, %v1164_v26  ;;  %1296 = vrot.lane.b32.xlu0 %v1164_v26, %s2281_s15 }
 0x4b5   : > { %1433 = vst.msk [vmem:[#allocation2 + $0x60] sm:$0xf] %vm1408_vm2, %v1400_v20  ;;  %v1269_v13 = vpop.permute.xlu1 %1268 }
 0x4b6   : > { %1354 = vst.msk [vmem:[%s3274_s6 + $0x50] sm:$0xff] %vm1183_vm1, %v1269_v13 }
 0x4b8   : > { %v1165_v28 = vpop.f32.mrf.mxu3 }
 0x4b9   : > { %v1166_v11 = vadd.f32 %v1165_v28, %v1076_v44  ;;  %v1091_v27 = vpop.f32.mrf.mxu0 }
 0x4bb   : > { %1209 = vst.msk [vmem:[%s3273_s5 + $0xc8] sm:$0xff] %vm1183_vm1, %v1166_v11  ;;  %v1401_v29 = vpack.c.bf16 %v1166_v11, %v1166_v11  ;;  %1298 = vrot.lane.b32.xlu1 %v1166_v11, %s2281_s15 }
 0x4bd   : > { %1434 = vst.msk [vmem:[#allocation2 + $0x64] sm:$0xf] %vm1408_vm2, %v1401_v29  ;;  %v1277_v1 = vpop.permute.xlu2 %1276 }
 0x4be   : > { %1358 = vst.msk [vmem:[%s3274_s6 + $0x70] sm:$0xff] %vm1183_vm1, %v1277_v1 }
 0x4c0   : > { %v1168_v40 = vpop.f32.mrf.mxu3 }
 0x4c1   : > { %v1169_v60 = vadd.f32 %v1168_v40, %v1079_v23 }
 0x4c3   : > { %1210 = vst.msk [vmem:[%s3273_s5 + $0xd0] sm:$0xff] %vm1183_vm1, %v1169_v60  ;;  %v1402_v33 = vpack.c.bf16 %v1169_v60, %v1169_v60  ;;  %1300 = vrot.lane.b32.xlu2 %v1169_v60, %s2281_s15 }
 0x4c5   : > { %1435 = vst.msk [vmem:[#allocation2 + $0x68] sm:$0xf] %vm1408_vm2, %v1402_v33  ;;  %v1273_v48 = vpop.permute.xlu0 %1272 }
 0x4c6   : > { %1356 = vst.msk [vmem:[%s3274_s6 + $0x60] sm:$0xff] %vm1183_vm1, %v1273_v48 }
 0x4c8   : > { %v1170_v42 = vpop.f32.mrf.mxu3 }
 0x4c9   : > { %v1171_v34 = vadd.f32 %v1170_v42, %v1081_v5 }
 0x4cb   : > { %1211 = vst.msk [vmem:[%s3273_s5 + $0xd8] sm:$0xff] %vm1183_vm1, %v1171_v34  ;;  %v1403_v49 = vpack.c.bf16 %v1171_v34, %v1171_v34  ;;  %1302 = vrot.lane.b32.xlu0 %v1171_v34, %s2281_s15 }
 0x4cd   : > { %1436 = vst.msk [vmem:[#allocation2 + $0x6c] sm:$0xf] %vm1408_vm2, %v1403_v49  ;;  %v1275_v43 = vpop.permute.xlu1 %1274 }
 0x4ce   : > { %1357 = vst.msk [vmem:[%s3274_s6 + $0x68] sm:$0xff] %vm1183_vm1, %v1275_v43 }
 0x4d0   : > { %v1173_v52 = vpop.f32.mrf.mxu3 }
 0x4d1   : > { %v1174_v19 = vadd.f32 %v1173_v52, %v1084_v22 }
 0x4d3   : > { %1212 = vst.msk [vmem:[%s3273_s5 + $0xe0] sm:$0xff] %vm1183_vm1, %v1174_v19  ;;  %v1404_v55 = vpack.c.bf16 %v1174_v19, %v1174_v19  ;;  %1304 = vrot.lane.b32.xlu1 %v1174_v19, %s2281_s15 }
 0x4d5   : > { %1437 = vst.msk [vmem:[#allocation2 + $0x70] sm:$0xf] %vm1408_vm2, %v1404_v55  ;;  %v1283_v61 = vpop.permute.xlu2 %1282 }
 0x4d6   : > { %1361 = vst.msk [vmem:[%s3274_s6 + $0x88] sm:$0xff] %vm1183_vm1, %v1283_v61 }
 0x4d8   : > { %v1175_v0 = vpop.f32.mrf.mxu3 }
 0x4d9   : > { %v1176_v3 = vadd.f32 %v1175_v0, %v1086_v58 }
 0x4db   : > { %1213 = vst.msk [vmem:[%s3273_s5 + $0xe8] sm:$0xff] %vm1183_vm1, %v1176_v3  ;;  %v1405_v6 = vpack.c.bf16 %v1176_v3, %v1176_v3  ;;  %1306 = vrot.lane.b32.xlu2 %v1176_v3, %s2281_s15 }
 0x4dd   : > { %1438 = vst.msk [vmem:[#allocation2 + $0x74] sm:$0xf] %vm1408_vm2, %v1405_v6  ;;  %v1279_v9 = vpop.permute.xlu0 %1278 }
 0x4de   : > { %1359 = vst.msk [vmem:[%s3274_s6 + $0x78] sm:$0xff] %vm1183_vm1, %v1279_v9 }
 0x4e0   : > { %v1178_v15 = vpop.f32.mrf.mxu3 }
 0x4e1   : > { %v1179_v18 = vadd.f32 %v1178_v15, %v1089_v12 }
 0x4e3   : > { %1214 = vst.msk [vmem:[%s3273_s5 + $0xf0] sm:$0xff] %vm1183_vm1, %v1179_v18  ;;  %v1406_v21 = vpack.c.bf16 %v1179_v18, %v1179_v18  ;;  %1308 = vrot.lane.b32.xlu0 %v1179_v18, %s2281_s15 }
 0x4e5   : > { %1439 = vst.msk [vmem:[#allocation2 + $0x78] sm:$0xf] %vm1408_vm2, %v1406_v21  ;;  %v1281_v24 = vpop.permute.xlu1 %1280 }
 0x4e6   : > { %1360 = vst.msk [vmem:[%s3274_s6 + $0x80] sm:$0xff] %vm1183_vm1, %v1281_v24 }
 0x4e8   : > { %v1180_v30 = vpop.f32.mrf.mxu3 }
 0x4e9   : > { %v1181_v37 = vadd.f32 %v1180_v30, %v1091_v27 }
 0x4eb   : > { %1215 = vst.msk [vmem:[%s3273_s5 + $0xf8] sm:$0xff] %vm1183_vm1, %v1181_v37  ;;  %v1407_v56 = vpack.c.bf16 %v1181_v37, %v1181_v37  ;;  %1310 = vrot.lane.b32.xlu1 %v1181_v37, %s2281_s15 }
 0x4ed   : > { %1440 = vst.msk [vmem:[#allocation2 + $0x7c] sm:$0xf] %vm1408_vm2, %v1407_v56  ;;  %v1289_v14 = vpop.permute.xlu2 %1288 }
 0x4ee   : > { %1364 = vst.msk [vmem:[%s3274_s6 + $0xa0] sm:$0xff] %vm1183_vm1, %v1289_v14 }
 0x4f5   : > { %v1285_v35 = vpop.permute.xlu0 %1284 }
 0x4f6   : > { %1362 = vst.msk [vmem:[%s3274_s6 + $0x90] sm:$0xff] %vm1183_vm1, %v1285_v35 }
 0x4fd   : > { %v1287_v45 = vpop.permute.xlu1 %1286 }
 0x4fe   : > { %1363 = vst.msk [vmem:[%s3274_s6 + $0x98] sm:$0xff] %vm1183_vm1, %v1287_v45 }
 0x505   : > { %v1295_v63 = vpop.permute.xlu2 %1294 }
 0x506   : > { %1367 = vst.msk [vmem:[%s3274_s6 + $0xb8] sm:$0xff] %vm1183_vm1, %v1295_v63 }
 0x50d   : > { %v1291_v31 = vpop.permute.xlu0 %1290 }
 0x50e   : > { %1365 = vst.msk [vmem:[%s3274_s6 + $0xa8] sm:$0xff] %vm1183_vm1, %v1291_v31 }
 0x515   : > { %v1293_v38 = vpop.permute.xlu1 %1292 }
 0x516   : > { %1366 = vst.msk [vmem:[%s3274_s6 + $0xb0] sm:$0xff] %vm1183_vm1, %v1293_v38 }
 0x51d   : > { %v1301_v39 = vpop.permute.xlu2 %1300 }
 0x51e   : > { %1370 = vst.msk [vmem:[%s3274_s6 + $0xd0] sm:$0xff] %vm1183_vm1, %v1301_v39 }
 0x525   : > { %v1297_v41 = vpop.permute.xlu0 %1296 }
 0x526   : > { %1368 = vst.msk [vmem:[%s3274_s6 + $0xc0] sm:$0xff] %vm1183_vm1, %v1297_v41 }
 0x52d   : > { %v1299_v46 = vpop.permute.xlu1 %1298 }
 0x52e   : > { %1369 = vst.msk [vmem:[%s3274_s6 + $0xc8] sm:$0xff] %vm1183_vm1, %v1299_v46 }
 0x535   : > { %v1307_v47 = vpop.permute.xlu2 %1306 }
 0x536   : > { %1373 = vst.msk [vmem:[%s3274_s6 + $0xe8] sm:$0xff] %vm1183_vm1, %v1307_v47 }
 0x53d   : > { %v1303_v2 = vpop.permute.xlu0 %1302 }
 0x53e   : > { %1371 = vst.msk [vmem:[%s3274_s6 + $0xd8] sm:$0xff] %vm1183_vm1, %v1303_v2 }
 0x545   : > { %v1305_v32 = vpop.permute.xlu1 %1304 }
 0x546   : > { %1372 = vst.msk [vmem:[%s3274_s6 + $0xe0] sm:$0xff] %vm1183_vm1, %v1305_v32 }
 0x555   : > { %v1309_v50 = vpop.permute.xlu0 %1308 }
 0x556   : > { %1374 = vst.msk [vmem:[%s3274_s6 + $0xf0] sm:$0xff] %vm1183_vm1, %v1309_v50 }
 0x55d   : > { %v1311_v51 = vpop.permute.xlu1 %1310 }
 0x55e   : > { %1375 = vst.msk [vmem:[%s3274_s6 + $0xf8] sm:$0xff] %vm1183_vm1, %v1311_v51 }
 0x55f PF: > { %v2090_v53 = vld [vmem:[#allocation2 + $0x38] sm:$0xff]  ;;  %vm1614_vm3 = vcmask 261120   ;;  %v2089_v25 = vld [vmem:[#allocation2 + $0x30] sm:$0xff]  ;;  %v2088_v8 = vld [vmem:[#allocation2 + $0x28] sm:$0xff]  ;;  %s1955_s19 = sshll.u32 %s2345_s28, 7  ;;  %s2100_s29 = sshll.u32 %s2345_s28, 8 }
 0x560   : > { %v2098_v59 = vld [vmem:[#allocation2 + $0x78] sm:$0xff]  ;;  %v1661_v57 = vsel %vm1614_vm3, %v2090_v53, 0  ;;  %v2097_v4 = vld [vmem:[#allocation2 + $0x70] sm:$0xff]  ;;  %v1658_v54 = vsel %vm1614_vm3, %v2089_v25, 0  ;;  %v2096_v10 = vld [vmem:[#allocation2 + $0x68] sm:$0xff]  ;;  %v1655_v16 = vsel %vm1614_vm3, %v2088_v8, 0  ;;  %s1839_s13 = scalar_lea.hbm %s3275_s7, %s2100_s29 }
 0x561   : > { %v1685_v62 = vsel %vm1614_vm3, %v2098_v59, 0  ;;  %1687 = vmatpush.bf16.xpose.msra.mxu0 %v1661_v57  ;;  %2109 = vmatpush.bf16.xpose.msra.mxu2 %v1661_v57  ;;  %v1682_v7 = vsel %vm1614_vm3, %v2097_v4, 0  ;;  %v1679_v44 = vsel %vm1614_vm3, %v2096_v10, 0  ;;  %v2087_v36 = vld [vmem:[#allocation2 + $0x20] sm:$0xff]  ;;  %v2086_v13 = vld [vmem:[#allocation2 + $0x18] sm:$0xff]  ;;  %v2085_v29 = vld [vmem:[#allocation2 + $0x10] sm:$0xff] }
 0x562   : > { %1736 = vmatpush.bf16.xpose.msra.mxu1 %v1685_v62  ;;  %2117 = vmatpush.bf16.xpose.msra.mxu3 %v1685_v62  ;;  %v2095_v17 = vld [vmem:[#allocation2 + $0x60] sm:$0xff]  ;;  %v1652_v26 = vsel %vm1614_vm3, %v2087_v36, 0  ;;  %v2094_v23 = vld [vmem:[#allocation2 + $0x58] sm:$0xff]  ;;  %v1649_v28 = vsel %vm1614_vm3, %v2086_v13, 0  ;;  %v2093_v1 = vld [vmem:[#allocation2 + $0x50] sm:$0xff]  ;;  %v1646_v40 = vsel %vm1614_vm3, %v2085_v29, 0 }
 0x563   : > { %v1676_v20 = vsel %vm1614_vm3, %v2095_v17, 0  ;;  %v1673_v11 = vsel %vm1614_vm3, %v2094_v23, 0  ;;  %v1670_v5 = vsel %vm1614_vm3, %v2093_v1, 0  ;;  %v2084_v60 = vld [vmem:[#allocation2 + $0x8] sm:$0xff]  ;;  %v2083_v34 = vld [vmem:[#allocation2] sm:$0xff]  ;;  %s1442_s21 = sshra.s32 %s1955_s19, 3 }
 0x564   : > { %v2092_v33 = vld [vmem:[#allocation2 + $0x48] sm:$0xff]  ;;  %v1643_v48 = vsel %vm1614_vm3, %v2084_v60, 0  ;;  %v2091_v22 = vld [vmem:[#allocation2 + $0x40] sm:$0xff]  ;;  %v1640_v49 = vsel %vm1614_vm3, %v2083_v34, 0  ;;  %s1956_s15 = sshll.u32 %s1442_s21, 2  ;;  %s1840_s14 = sshll.u32 %s2386_s22, 4  ;;  %s1841_s14 = int_to_ptr.vmem [resolvable:$true] %s1840_s14 }
 0x565   : > { %v1667_v42 = vsel %vm1614_vm3, %v2092_v33, 0  ;;  %v1664_v43 = vsel %vm1614_vm3, %v2091_v22, 0  ;;  %s1445_s23 = scalar_lea.vmem [#allocation2], %s1956_s15  ;;  %s1842_s16 = sshll.u32 %s1839_s13, 4  ;;  %s1843_s16 = int_to_ptr.hbm [resolvable:$true] %s1842_s16 }
 0x566   : > { %v2075_v52 = vld [vmem:[%s1445_s23] sm:$0xff]  ;;  %v2076_v55 = vld [vmem:[%s1445_s23 + $0x8] sm:$0xff]  ;;  %v2077_v61 = vld [vmem:[%s1445_s23 + $0x10] sm:$0xff]  ;;  %s1818_s28 = scalar_lea.sflag [#allocation5], %s263_s20  ;;  %s2224_s17 = sshra.s32 %s1843_s16, 4  ;;  %s2225_s17 = int_to_ptr.hbm [resolvable:$true] %s2224_s17 }
 0x567   : > { %v2079_v19 = vld [vmem:[%s1445_s23 + $0x20] sm:$0xff]  ;;  %v2080_v58 = vld [vmem:[%s1445_s23 + $0x28] sm:$0xff]  ;;  %v2081_v0 = vld [vmem:[%s1445_s23 + $0x30] sm:$0xff]  ;;  %s2226_s18 = scalar_lea.hbm %s2225_s17, 256  ;;  %s2230_s15 = scalar_lea.hbm %s3275_s7, 512 }
 0x568   : > { %v2078_v3 = vld [vmem:[%s1445_s23 + $0x18] sm:$0xff]  ;;  %p2227_p0 = scmp.ne.s32.totalorder %s2225_s17, %s2226_s18  ;;  %p2231_p3 = scmp.lt.s32.totalorder %s2225_s17, %s3275_s7 }
 0x569   : > { %1688 = vmatpush.bf16.xpose.msra.mxu0 %v1658_v54  ;;  %2110 = vmatpush.bf16.xpose.msra.mxu2 %v1658_v54  ;;  %v2082_v6 = vld [vmem:[%s1445_s23 + $0x38] sm:$0xff]  ;;  %p2232_p4 = scmp.lt.s32.totalorder %s2230_s15, %s2226_s18 }
 0x56a   : > { %1737 = vmatpush.bf16.xpose.msra.mxu1 %v1682_v7  ;;  %2118 = vmatpush.bf16.xpose.msra.mxu3 %v1682_v7  ;;  %p2228_p1 = pnand %p2227_p0, %p2362_p5 }
 0x56b   : > { %p2233_p7 = por %p2232_p4, %p2231_p3 }
 0x56c   : > { %p2229_p2 = pneg %p2228_p1 }
 0x56e   : > { %p2234_p8 = pnand %p2233_p7, %p2229_p2 }
 0x571   : > { %1689 = vmatpush.bf16.xpose.msra.mxu0 %v1655_v16  ;;  %2111 = vmatpush.bf16.xpose.msra.mxu2 %v1655_v16 }
 0x572   : > { %1738 = vmatpush.bf16.xpose.msra.mxu1 %v1679_v44  ;;  %2119 = vmatpush.bf16.xpose.msra.mxu3 %v1679_v44 }
 0x579   : > { %1690 = vmatpush.bf16.xpose.msra.mxu0 %v1652_v26  ;;  %2112 = vmatpush.bf16.xpose.msra.mxu2 %v1652_v26 }
 0x57a   : > { %1739 = vmatpush.bf16.xpose.msra.mxu1 %v1676_v20  ;;  %2120 = vmatpush.bf16.xpose.msra.mxu3 %v1676_v20 }
 0x581   : > { %1691 = vmatpush.bf16.xpose.msra.mxu0 %v1649_v28  ;;  %2113 = vmatpush.bf16.xpose.msra.mxu2 %v1649_v28 }
 0x582   : > { %1740 = vmatpush.bf16.xpose.msra.mxu1 %v1673_v11  ;;  %2121 = vmatpush.bf16.xpose.msra.mxu3 %v1673_v11 }
 0x589   : > { %1692 = vmatpush.bf16.xpose.msra.mxu0 %v1646_v40  ;;  %2114 = vmatpush.bf16.xpose.msra.mxu2 %v1646_v40 }
 0x58a   : > { %1741 = vmatpush.bf16.xpose.msra.mxu1 %v1670_v5  ;;  %2122 = vmatpush.bf16.xpose.msra.mxu3 %v1670_v5 }
 0x591   : > { %1693 = vmatpush.bf16.xpose.msra.mxu0 %v1643_v48  ;;  %2115 = vmatpush.bf16.xpose.msra.mxu2 %v1643_v48 }
 0x592   : > { %1742 = vmatpush.bf16.xpose.msra.mxu1 %v1667_v42  ;;  %2123 = vmatpush.bf16.xpose.msra.mxu3 %v1667_v42 }
 0x599   : > { %1694 = vmatpush.bf16.xpose.msra.mxu0 %v1640_v49  ;;  %2116 = vmatpush.bf16.xpose.msra.mxu2 %v1640_v49 }
 0x59a   : > { %1743 = vmatpush.bf16.xpose.msra.mxu1 %v1664_v43  ;;  %2124 = vmatpush.bf16.xpose.msra.mxu3 %v1664_v43 }
 0x5a0   : > { %2053 = vmatmul.msk.bf16.vlgmr.msra.gmra.mxu0 %vm1614_vm3, %v2075_v52  ;;  %2057 = vmatmul.msk.bf16.vlgmr.msra.gmra.mxu2 %vm1614_vm3, %v2079_v19 }
 0x5a1   : > { %2061 = vmatmul.msk.bf16.vlgmr.msra.gmra.mxu1 %vm1614_vm3, %v2075_v52  ;;  %2065 = vmatmul.msk.bf16.vlgmr.msra.gmra.mxu3 %vm1614_vm3, %v2079_v19 }
 0x5b0   : > { %2054 = vmatmul.msk.bf16.gmra.mxu0 %vm1614_vm3, %v2076_v55  ;;  %2058 = vmatmul.msk.bf16.gmra.mxu2 %vm1614_vm3, %v2080_v58 }
 0x5b1   : > { %2062 = vmatmul.msk.bf16.gmra.mxu1 %vm1614_vm3, %v2076_v55  ;;  %2066 = vmatmul.msk.bf16.gmra.mxu3 %vm1614_vm3, %v2080_v58 }
 0x5c0   : > { %2055 = vmatmul.msk.bf16.gmra.mxu0 %vm1614_vm3, %v2077_v61  ;;  %2059 = vmatmul.msk.bf16.gmra.mxu2 %vm1614_vm3, %v2081_v0 }
 0x5c1   : > { %2063 = vmatmul.msk.bf16.gmra.mxu1 %vm1614_vm3, %v2077_v61  ;;  %2067 = vmatmul.msk.bf16.gmra.mxu3 %vm1614_vm3, %v2081_v0 }
 0x5d0   : > { %2056 = vmatmul.msk.bf16.gmra.mxu0 %vm1614_vm3, %v2078_v3  ;;  %2060 = vmatmul.msk.bf16.gmra.mxu2 %vm1614_vm3, %v2082_v6 }
 0x5d1   : > { %2064 = vmatmul.msk.bf16.gmra.mxu1 %vm1614_vm3, %v2078_v3  ;;  %2068 = vmatmul.msk.bf16.gmra.mxu3 %vm1614_vm3, %v2082_v6 }
 0x61d   : > { %v1696_v9 = vpop.f32.mrf.mxu0 }
 0x61e   : > { %1785 = vst [vmem:[%s2386_s22] sm:$0xff] %v1696_v9  ;;  %v1745_v12 = vpop.f32.mrf.mxu1 }
 0x61f   : > { %1786 = vst [vmem:[%s2386_s22 + $0x8] sm:$0xff] %v1745_v12 }
 0x623   : > { %v1716_v15 = vpop.f32.mrf.mxu2 }
 0x624   : > { %1801 = vst [vmem:[%s2386_s22 + $0x80] sm:$0xff] %v1716_v15  ;;  %v1765_v18 = vpop.f32.mrf.mxu3 }
 0x625   : > { %1802 = vst [vmem:[%s2386_s22 + $0x88] sm:$0xff] %v1765_v18  ;;  %v1698_v21 = vpop.f32.mrf.mxu0 }
 0x626   : > { %1787 = vst [vmem:[%s2386_s22 + $0x10] sm:$0xff] %v1698_v21  ;;  %v1747_v24 = vpop.f32.mrf.mxu1 }
 0x627   : > { %1788 = vst [vmem:[%s2386_s22 + $0x18] sm:$0xff] %v1747_v24 }
 0x62b   : > { %v1718_v27 = vpop.f32.mrf.mxu2 }
 0x62c   : > { %1803 = vst [vmem:[%s2386_s22 + $0x90] sm:$0xff] %v1718_v27  ;;  %v1767_v30 = vpop.f32.mrf.mxu3 }
 0x62d   : > { %1804 = vst [vmem:[%s2386_s22 + $0x98] sm:$0xff] %v1767_v30  ;;  %v1701_v37 = vpop.f32.mrf.mxu0 }
 0x62e   : > { %1789 = vst [vmem:[%s2386_s22 + $0x20] sm:$0xff] %v1701_v37  ;;  %v1750_v56 = vpop.f32.mrf.mxu1 }
 0x62f   : > { %1790 = vst [vmem:[%s2386_s22 + $0x28] sm:$0xff] %v1750_v56 }
 0x633   : > { %v1721_v14 = vpop.f32.mrf.mxu2 }
 0x634   : > { %1805 = vst [vmem:[%s2386_s22 + $0xa0] sm:$0xff] %v1721_v14  ;;  %v1770_v35 = vpop.f32.mrf.mxu3 }
 0x635   : > { %1806 = vst [vmem:[%s2386_s22 + $0xa8] sm:$0xff] %v1770_v35  ;;  %v1703_v45 = vpop.f32.mrf.mxu0 }
 0x636   : > { %1791 = vst [vmem:[%s2386_s22 + $0x30] sm:$0xff] %v1703_v45  ;;  %v1752_v63 = vpop.f32.mrf.mxu1 }
 0x637   : > { %1792 = vst [vmem:[%s2386_s22 + $0x38] sm:$0xff] %v1752_v63 }
 0x63b   : > { %v1723_v31 = vpop.f32.mrf.mxu2 }
 0x63c   : > { %1807 = vst [vmem:[%s2386_s22 + $0xb0] sm:$0xff] %v1723_v31  ;;  %v1772_v38 = vpop.f32.mrf.mxu3 }
 0x63d   : > { %1808 = vst [vmem:[%s2386_s22 + $0xb8] sm:$0xff] %v1772_v38  ;;  %v1706_v39 = vpop.f32.mrf.mxu0 }
 0x63e   : > { %1793 = vst [vmem:[%s2386_s22 + $0x40] sm:$0xff] %v1706_v39  ;;  %v1755_v41 = vpop.f32.mrf.mxu1 }
 0x63f   : > { %1794 = vst [vmem:[%s2386_s22 + $0x48] sm:$0xff] %v1755_v41 }
 0x643   : > { %v1726_v46 = vpop.f32.mrf.mxu2 }
 0x644   : > { %1809 = vst [vmem:[%s2386_s22 + $0xc0] sm:$0xff] %v1726_v46  ;;  %v1775_v47 = vpop.f32.mrf.mxu3 }
 0x645   : > { %1810 = vst [vmem:[%s2386_s22 + $0xc8] sm:$0xff] %v1775_v47  ;;  %v1708_v2 = vpop.f32.mrf.mxu0 }
 0x646   : > { %1795 = vst [vmem:[%s2386_s22 + $0x50] sm:$0xff] %v1708_v2  ;;  %v1757_v32 = vpop.f32.mrf.mxu1 }
 0x647   : > { %1796 = vst [vmem:[%s2386_s22 + $0x58] sm:$0xff] %v1757_v32 }
 0x64b   : > { %v1728_v50 = vpop.f32.mrf.mxu2 }
 0x64c   : > { %1811 = vst [vmem:[%s2386_s22 + $0xd0] sm:$0xff] %v1728_v50  ;;  %v1777_v51 = vpop.f32.mrf.mxu3 }
 0x64d   : > { %1812 = vst [vmem:[%s2386_s22 + $0xd8] sm:$0xff] %v1777_v51  ;;  %v1711_v53 = vpop.f32.mrf.mxu0 }
 0x64e   : > { %1797 = vst [vmem:[%s2386_s22 + $0x60] sm:$0xff] %v1711_v53  ;;  %v1760_v59 = vpop.f32.mrf.mxu1 }
 0x64f   : > { %1798 = vst [vmem:[%s2386_s22 + $0x68] sm:$0xff] %v1760_v59 }
 0x653   : > { %v1731_v57 = vpop.f32.mrf.mxu2 }
 0x654   : > { %1813 = vst [vmem:[%s2386_s22 + $0xe0] sm:$0xff] %v1731_v57  ;;  %v1780_v62 = vpop.f32.mrf.mxu3 }
 0x655   : > { %1814 = vst [vmem:[%s2386_s22 + $0xe8] sm:$0xff] %v1780_v62  ;;  %v1713_v25 = vpop.f32.mrf.mxu0 }
 0x656   : > { %1799 = vst [vmem:[%s2386_s22 + $0x70] sm:$0xff] %v1713_v25  ;;  %v1762_v4 = vpop.f32.mrf.mxu1 }
 0x657   : > { %1800 = vst [vmem:[%s2386_s22 + $0x78] sm:$0xff] %v1762_v4 }
 0x65b   : > { %v1733_v54 = vpop.f32.mrf.mxu2 }
 0x65c   : > { %1815 = vst [vmem:[%s2386_s22 + $0xf0] sm:$0xff] %v1733_v54  ;;  %v1782_v7 = vpop.f32.mrf.mxu3 }
 0x65d   : > { %1816 = vst [vmem:[%s2386_s22 + $0xf8] sm:$0xff] %v1782_v7 }
 0x65e   : > { %2237 = shalt.err (!%p2234_p8)
}
 0x65f   : > { %s2282_s20 = smov 256   ;;  %s2283_s22 = smov 16  }
 0x660   : > { %2129 = dma.vmem_to_hbm [thread:$0]  (%p2362_p5), %s1841_s14, 4096, %s1843_s16, %s1818_s28, %s2282_s20, %s2282_s20, %s2283_s22  }
 0x661 PF: > { %p2141_p9 = scmp.ge.s32.totalorder %s2276_s27, 2  ;;  %s1866_s8 = sand.u32 1, %s2264_s24  }
 0x662   : > { %s1867_s9 = scalar_lea.sflag [#allocation5], %s1866_s8 }
 0x663   : > { %p2136_p10 = pnand %p2141_p9, %p2366_p6 }
 0x665   : > { %p2137_p11 = pneg %p2136_p10 }
 0x667   : > { %2259 = dma.done.wait (%p2137_p11), %s1867_s9, 4096  }
 0x668   : > { %2261 = vsyncadd (%p2137_p11), %s1867_s9, 4294963200  ;;  %p19_p12 = scmp.ge.s32.totalorder %s2349_s30, 4   ;;  %s3278_s24 = smov %s2268_s25 }
 0x669   : > { %s3279_s25 = smov %s2272_s26  ;;  %s3280_s26 = smov %s2360_s10 }
 0x66a   : > { %s3281_s27 = smov %s2349_s30  ;;  %21 = sbr.rel (!%p19_p12) target bundleno = 4 (0x4), region = 102 }
 0x66f   :  { %1873 = vsyncpa [#allocation4], 1 }
 0x670   :  { %1875 = vsyncpa [#allocation4 + $0x1], 1 }
 0x671   :  { %1876 = vsyncpa [#allocation5], 1 }
 0x672   :  { %1878 = vsyncpa [#allocation5 + $0x1], 1 }

</bundles_post_ra>
